<compile_context>
chip_gen: v6e
topology: v6e:2x2x1
jax: 0.10.0
libtpu: 0.0.40
codegen_flags: <defaults>
</compile_context>

<pallas_src>
import numpy as np
import jax
import jax.numpy as jnp
from jax.experimental import pallas as pl
from jax.experimental.pallas import tpu as pltpu

# ---- constants from the PyTorch module ------------------------------------
EMBEDDING_SIZE = 512          # embedding_size
NB_POSTAGS = 1                # nb_postags
H = 100                       # postag_hn_size
NB_LAYERS = 2                 # postag_nb_layers
MAX_SENTENCE_SIZE = 16        # max_sentence_size (undefined in the snippet; chosen here)

HP = 128                      # hidden padded to one lane group
GW = 8 * HP                   # fused gate width: (i|f|g|o) x (fwd|bwd) = 1024
ACT_W = EMBEDDING_SIZE + 2 * GW + 2 * (2 * HP)   # 512+1024+1024+256+256 = 3072

# activation-slab column offsets (all multiples of 128 -> lane aligned)
_X0 = 0
_GB0 = EMBEDDING_SIZE                    # 512
_GB1 = _GB0 + GW                         # 1536
_C00 = _GB1 + GW                         # 2560
_C01 = _C00 + 2 * HP                     # 2816
_END = _C01 + 2 * HP                     # 3072
assert _END == ACT_W


# ---- Pallas kernel ---------------------------------------------------------
def stance_kernel(act_ref, w_ref, fc_ref, out_ref):
    """Single grid point: whole problem lives in VMEM.

    act_ref : (N, 3072) f32   [x(512) | gb0(1024) | gb1(1024) | c00(256) | c01(256)]
    w_ref   : (768, 1024) bf16 [W0(512 rows) ; W1(256 rows)]  input->gates, dirs fused
    fc_ref  : (8, 256) f32    row 0 = fc weight (padded), [1,0] = fc bias
    out_ref : (N, 1) f32      tags
    """
    x = act_ref[:, _X0:_GB0].astype(jnp.bfloat16)          # (N, 512) bf16
    gb0 = act_ref[:, _GB0:_GB1]                             # (N, 1024) f32
    gb1 = act_ref[:, _GB1:_C00]                             # (N, 1024) f32
    c00 = act_ref[:, _C00:_C01]                             # (N, 256)  f32
    c01 = act_ref[:, _C01:_END]                             # (N, 256)  f32

    w0 = w_ref[0:EMBEDDING_SIZE, :]                         # (512, 1024) bf16
    w1 = w_ref[EMBEDDING_SIZE:EMBEDDING_SIZE + 2 * HP, :]   # (256, 1024) bf16

    def layer(inp_bf16, w, gb, c0):
        # one bidirectional LSTM step (sequence length is 1 in this model)
        gates = (jnp.dot(inp_bf16, w, preferred_element_type=jnp.float32)
                 + gb)                                       # (N, 1024) f32
        i = jax.nn.sigmoid(gates[:, 0 * HP:2 * HP])          # [fwd | bwd]
        f = jax.nn.sigmoid(gates[:, 2 * HP:4 * HP])
        g = jnp.tanh(gates[:, 4 * HP:6 * HP])
        o = jax.nn.sigmoid(gates[:, 6 * HP:8 * HP])
        c = f * c0 + i * g
        return o * jnp.tanh(c)                               # (N, 256) = [h_f | h_b]

    h1 = layer(x, w0, gb0, c00)                              # layer 0
    h2 = layer(h1.astype(jnp.bfloat16), w1, gb1, c01)        # layer 1

    # final linear layer as VPU multiply + lane reduction
    fcw = fc_ref[0:1, :]                                     # (1, 256)
    fcb = fc_ref[1:2, 0:1]                                   # (1, 1)
    out_ref[...] = jnp.sum(h2 * fcw, axis=-1, keepdims=True) + fcb


# ---- one-time parameter packing (NOT in the per-call path) ------------------
def _pad_lanes(a):
    """Pad the last dim from H to HP with zeros."""
    return jnp.pad(a, [(0, 0)] * (a.ndim - 1) + [(0, HP - H)])


def prepare_params(params):
    """Pack/pad all weights ONCE (independent of seq_len)."""
    cells = params["cells"]
    h0 = params["h"]                           # (4, MAX, H)  initial hidden
    c0 = params["w"]                           # (4, MAX, H)  initial cell

    def pack_layer(layer):
        w_ih_f, w_hh_f, b_ih_f, b_hh_f = cells[2 * layer]
        w_ih_b, w_hh_b, b_ih_b, b_hh_b = cells[2 * layer + 1]

        wf_t, wb_t = w_ih_f.T, w_ih_b.T        # (in, 4H)

        # fused gate columns: [i_f|i_b|f_f|f_b|g_f|g_b|o_f|o_b], each HP wide
        blocks = []
        for k in range(4):
            blocks.append(_pad_lanes(wf_t[:, k * H:(k + 1) * H]))
            blocks.append(_pad_lanes(wb_t[:, k * H:(k + 1) * H]))
        W = jnp.concatenate(blocks, axis=1)    # (in, 1024)

        if layer == 1:
            # layer-1 input is the fused (N, 256) = [h_fwd(128) | h_bwd(128)] slab
            W = jnp.concatenate(
                [jnp.pad(W[:H], ((0, HP - H), (0, 0))),
                 jnp.pad(W[H:2 * H], ((0, HP - H), (0, 0)))], axis=0)  # (256, 1024)

        # precomputed recurrent contribution + biases, same fused gate layout
        pre_f = h0[2 * layer] @ w_hh_f.T + b_ih_f + b_hh_f      # (MAX, 4H)
        pre_b = h0[2 * layer + 1] @ w_hh_b.T + b_ih_b + b_hh_b  # (MAX, 4H)
        gb_blocks = []
        for k in range(4):
            gb_blocks.append(_pad_lanes(pre_f[:, k * H:(k + 1) * H]))
            gb_blocks.append(_pad_lanes(pre_b[:, k * H:(k + 1) * H]))
        gb = jnp.concatenate(gb_blocks, axis=1)                 # (MAX, 1024)

        c0_l = jnp.concatenate([_pad_lanes(c0[2 * layer]),
                                _pad_lanes(c0[2 * layer + 1])], axis=1)  # (MAX, 256)
        return W, gb, c0_l

    W0, gb0, c00 = pack_layer(0)
    W1, gb1, c01 = pack_layer(1)

    # one bf16 weight slab: the dominant DMA, halved vs f32
    wslab = jnp.concatenate([W0, W1], axis=0).astype(jnp.bfloat16)   # (768, 1024)

    # one f32 per-row activation slab; x columns filled at call time
    act_base = jnp.concatenate(
        [jnp.zeros((MAX_SENTENCE_SIZE, EMBEDDING_SIZE), jnp.float32),
         gb0, gb1, c00, c01], axis=1).astype(jnp.float32)            # (16, 3072)

    # tiny f32 fc slab: row 0 = padded fc weight, element [1,0] = fc bias
    fc_w = params["fc_w"]                                            # (1, 2H)
    fcw = jnp.concatenate([_pad_lanes(fc_w[:, :H]),
                           _pad_lanes(fc_w[:, H:])], axis=1)         # (1, 256)
    fc_slab = jnp.zeros((8, 2 * HP), jnp.float32)
    fc_slab = fc_slab.at[0:1, :].set(fcw)
    fc_slab = fc_slab.at[1, 0].set(params["fc_b"][0])

    return dict(wslab=wslab, act_base=act_base, fc=fc_slab)


# ---- per-call wrapper: 3 DMA slabs cross the boundary -----------------------
def stance_forward(x, packed):
    seq_len = x.shape[0]
    assert seq_len <= MAX_SENTENCE_SIZE
    # drop x into the pre-packed slab (single fused update, handles row padding)
    act = jax.lax.dynamic_update_slice(
        packed["act_base"], x.astype(jnp.float32), (0, 0))

    out = pl.pallas_call(
        stance_kernel,
        out_shape=jax.ShapeDtypeStruct((MAX_SENTENCE_SIZE, NB_POSTAGS), jnp.float32),
        in_specs=[pl.BlockSpec(memory_space=pltpu.MemorySpace.VMEM)] * 3,
        out_specs=pl.BlockSpec(memory_space=pltpu.MemorySpace.VMEM),
        compiler_params=pltpu.CompilerParams(vmem_limit_bytes=8 * 1024 * 1024),
    )(act, packed["wslab"], packed["fc"])
    return out[:seq_len]


# ---- pure-JAX reference (for correctness check) ----------------------------
def stance_ref(x, params):
    N = x.shape[0]
    h0 = params["h"][:, :N, :]
    c0 = params["w"][:, :N, :]

    def cell(inp, h, c, w_ih, w_hh, b_ih, b_hh):
        gates = inp @ w_ih.T + b_ih + h @ w_hh.T + b_hh
        i, f, g, o = jnp.split(gates, 4, axis=-1)
        c2 = jax.nn.sigmoid(f) * c + jax.nn.sigmoid(i) * jnp.tanh(g)
        return jax.nn.sigmoid(o) * jnp.tanh(c2)

    cells = params["cells"]
    h_l0f = cell(x, h0[0], c0[0], *cells[0])
    h_l0b = cell(x, h0[1], c0[1], *cells[1])
    inp1 = jnp.concatenate([h_l0f, h_l0b], axis=-1)
    h_l1f = cell(inp1, h0[2], c0[2], *cells[2])
    h_l1b = cell(inp1, h0[3], c0[3], *cells[3])
    out = jnp.concatenate([h_l1f, h_l1b], axis=-1)
    return out @ params["fc_w"].T + params["fc_b"]


# ---- deterministic parameter init ------------------------------------------
def init_params(key):
    keys = iter(jax.random.split(key, 20))

    def rn(shape, scale=0.1):
        return scale * jax.random.normal(next(keys), shape, jnp.float32)

    # cells in PyTorch h0 order: layer0_fwd, layer0_bwd, layer1_fwd, layer1_bwd
    cells = []
    for in_dim in (EMBEDDING_SIZE, EMBEDDING_SIZE, 2 * H, 2 * H):
        cells.append((rn((4 * H, in_dim)),   # weight_ih
                      rn((4 * H, H)),        # weight_hh
                      rn((4 * H,)),          # bias_ih
                      rn((4 * H,))))         # bias_hh
    return {
        "cells": cells,
        "h": rn((NB_LAYERS * 2, MAX_SENTENCE_SIZE, H), 1.0),
        "w": rn((NB_LAYERS * 2, MAX_SENTENCE_SIZE, H), 1.0),
        "fc_w": rn((NB_POSTAGS, 2 * H)),
        "fc_b": rn((NB_POSTAGS,)),
    }


if __name__ == "__main__":
    key = jax.random.PRNGKey(0)
    pkey, xkey = jax.random.split(key)
    params = init_params(pkey)

    seq_len = 8   # number of words in the sentence (<= MAX_SENTENCE_SIZE)
    x = jax.random.normal(xkey, (seq_len, EMBEDDING_SIZE), jnp.float32)

    # one-time packing (seq_len independent); per-call path = one pallas_call
    packed = jax.tree_util.tree_map(jax.block_until_ready, prepare_params(params))

    fwd = jax.jit(stance_forward)
    tags = jax.block_until_ready(fwd(x, packed))
    assert tags.shape == (seq_len, NB_POSTAGS)

    ref = stance_ref(x, params)
    # bf16 weight storage -> slightly looser tolerance than pure-f32
    np.testing.assert_allclose(np.asarray(tags), np.asarray(ref),
                               rtol=2e-2, atol=2e-2)
    print("KERNEL_OK")
</pallas_src>

<mosaic_0001>
module attributes {stable_mosaic.version = 11 : i64} {
  func.func @stance_kernel(%arg0: memref<16x3072xf32, #tpu.memory_space<vmem>>, %arg1: memref<768x1024xbf16, #tpu.memory_space<vmem>>, %arg2: memref<8x256xf32, #tpu.memory_space<vmem>>, %arg3: memref<16x1xf32, #tpu.memory_space<vmem>>) attributes {dimension_semantics = [], scalar_prefetch = 0 : i64, scratch_operands = 0 : i64, tpu.core_type = #tpu.core_type<tc>} {
    %c0 = arith.constant 0 : index
    %c0_0 = arith.constant 0 : index
    %0 = vector.load %arg0[%c0, %c0_0] : memref<16x3072xf32, #tpu.memory_space<vmem>>, vector<16x512xf32>
    %1 = arith.truncf %0 : vector<16x512xf32> to vector<16x512xbf16>
    %c0_1 = arith.constant 0 : index
    %c512 = arith.constant 512 : index
    %2 = vector.load %arg0[%c0_1, %c512] : memref<16x3072xf32, #tpu.memory_space<vmem>>, vector<16x1024xf32>
    %c0_2 = arith.constant 0 : index
    %c1536 = arith.constant 1536 : index
    %3 = vector.load %arg0[%c0_2, %c1536] : memref<16x3072xf32, #tpu.memory_space<vmem>>, vector<16x1024xf32>
    %c0_3 = arith.constant 0 : index
    %c2560 = arith.constant 2560 : index
    %4 = vector.load %arg0[%c0_3, %c2560] : memref<16x3072xf32, #tpu.memory_space<vmem>>, vector<16x256xf32>
    %c0_4 = arith.constant 0 : index
    %c2816 = arith.constant 2816 : index
    %5 = vector.load %arg0[%c0_4, %c2816] : memref<16x3072xf32, #tpu.memory_space<vmem>>, vector<16x256xf32>
    %c0_5 = arith.constant 0 : index
    %c0_6 = arith.constant 0 : index
    %6 = vector.load %arg1[%c0_5, %c0_6] : memref<768x1024xbf16, #tpu.memory_space<vmem>>, vector<512x1024xbf16>
    %c512_7 = arith.constant 512 : index
    %c0_8 = arith.constant 0 : index
    %7 = vector.load %arg1[%c512_7, %c0_8] : memref<768x1024xbf16, #tpu.memory_space<vmem>>, vector<256x1024xbf16>
    %cst = arith.constant dense<0.000000e+00> : vector<16x1024xf32>
    %8 = tpu.matmul %1, %6, %cst {dimension_numbers = #tpu.dot_dimension_numbers<[1], [0], [0], [1], [0, 0, 1, 1], [], []>} : vector<16x512xbf16>, vector<512x1024xbf16>, vector<16x1024xf32> -> vector<16x1024xf32>
    %9 = arith.addf %8, %2 : vector<16x1024xf32>
    %10 = vector.extract_strided_slice %9 {offsets = [0, 0], sizes = [16, 256], strides = [1, 1]} : vector<16x1024xf32> to vector<16x256xf32>
    %11 = arith.negf %10 : vector<16x256xf32>
    %12 = math.exp %11 : vector<16x256xf32>
    %cst_9 = arith.constant 1.000000e+00 : f32
    %13 = vector.broadcast %cst_9 : f32 to vector<16x256xf32>
    %14 = arith.addf %13, %12 : vector<16x256xf32>
    %15 = arith.divf %13, %14 : vector<16x256xf32>
    %16 = vector.extract_strided_slice %9 {offsets = [0, 256], sizes = [16, 256], strides = [1, 1]} : vector<16x1024xf32> to vector<16x256xf32>
    %17 = arith.negf %16 : vector<16x256xf32>
    %18 = math.exp %17 : vector<16x256xf32>
    %cst_10 = arith.constant 1.000000e+00 : f32
    %19 = vector.broadcast %cst_10 : f32 to vector<16x256xf32>
    %20 = arith.addf %19, %18 : vector<16x256xf32>
    %21 = arith.divf %19, %20 : vector<16x256xf32>
    %22 = vector.extract_strided_slice %9 {offsets = [0, 512], sizes = [16, 256], strides = [1, 1]} : vector<16x1024xf32> to vector<16x256xf32>
    %23 = math.tanh %22 : vector<16x256xf32>
    %24 = vector.extract_strided_slice %9 {offsets = [0, 768], sizes = [16, 256], strides = [1, 1]} : vector<16x1024xf32> to vector<16x256xf32>
    %25 = arith.negf %24 : vector<16x256xf32>
    %26 = math.exp %25 : vector<16x256xf32>
    %cst_11 = arith.constant 1.000000e+00 : f32
    %27 = vector.broadcast %cst_11 : f32 to vector<16x256xf32>
    %28 = arith.addf %27, %26 : vector<16x256xf32>
    %29 = arith.divf %27, %28 : vector<16x256xf32>
    %30 = arith.mulf %21, %4 : vector<16x256xf32>
    %31 = arith.mulf %15, %23 : vector<16x256xf32>
    %32 = arith.addf %30, %31 : vector<16x256xf32>
    %33 = math.tanh %32 : vector<16x256xf32>
    %34 = arith.mulf %29, %33 : vector<16x256xf32>
    %35 = arith.truncf %34 : vector<16x256xf32> to vector<16x256xbf16>
    %cst_12 = arith.constant dense<0.000000e+00> : vector<16x1024xf32>
    %36 = tpu.matmul %35, %7, %cst_12 {dimension_numbers = #tpu.dot_dimension_numbers<[1], [0], [0], [1], [0, 0, 1, 1], [], []>} : vector<16x256xbf16>, vector<256x1024xbf16>, vector<16x1024xf32> -> vector<16x1024xf32>
    %37 = arith.addf %36, %3 : vector<16x1024xf32>
    %38 = vector.extract_strided_slice %37 {offsets = [0, 0], sizes = [16, 256], strides = [1, 1]} : vector<16x1024xf32> to vector<16x256xf32>
    %39 = arith.negf %38 : vector<16x256xf32>
    %40 = math.exp %39 : vector<16x256xf32>
    %cst_13 = arith.constant 1.000000e+00 : f32
    %41 = vector.broadcast %cst_13 : f32 to vector<16x256xf32>
    %42 = arith.addf %41, %40 : vector<16x256xf32>
    %43 = arith.divf %41, %42 : vector<16x256xf32>
    %44 = vector.extract_strided_slice %37 {offsets = [0, 256], sizes = [16, 256], strides = [1, 1]} : vector<16x1024xf32> to vector<16x256xf32>
    %45 = arith.negf %44 : vector<16x256xf32>
    %46 = math.exp %45 : vector<16x256xf32>
    %cst_14 = arith.constant 1.000000e+00 : f32
    %47 = vector.broadcast %cst_14 : f32 to vector<16x256xf32>
    %48 = arith.addf %47, %46 : vector<16x256xf32>
    %49 = arith.divf %47, %48 : vector<16x256xf32>
    %50 = vector.extract_strided_slice %37 {offsets = [0, 512], sizes = [16, 256], strides = [1, 1]} : vector<16x1024xf32> to vector<16x256xf32>
    %51 = math.tanh %50 : vector<16x256xf32>
    %52 = vector.extract_strided_slice %37 {offsets = [0, 768], sizes = [16, 256], strides = [1, 1]} : vector<16x1024xf32> to vector<16x256xf32>
    %53 = arith.negf %52 : vector<16x256xf32>
    %54 = math.exp %53 : vector<16x256xf32>
    %cst_15 = arith.constant 1.000000e+00 : f32
    %55 = vector.broadcast %cst_15 : f32 to vector<16x256xf32>
    %56 = arith.addf %55, %54 : vector<16x256xf32>
    %57 = arith.divf %55, %56 : vector<16x256xf32>
    %58 = arith.mulf %49, %5 : vector<16x256xf32>
    %59 = arith.mulf %43, %51 : vector<16x256xf32>
    %60 = arith.addf %58, %59 : vector<16x256xf32>
    %61 = math.tanh %60 : vector<16x256xf32>
    %62 = arith.mulf %57, %61 : vector<16x256xf32>
    %c0_16 = arith.constant 0 : index
    %c0_17 = arith.constant 0 : index
    %63 = vector.load %arg2[%c0_16, %c0_17] : memref<8x256xf32, #tpu.memory_space<vmem>>, vector<1x256xf32>
    %c1 = arith.constant 1 : index
    %c0_18 = arith.constant 0 : index
    %64 = vector.load %arg2[%c1, %c0_18] : memref<8x256xf32, #tpu.memory_space<vmem>>, vector<1x1xf32>
    %65 = vector.broadcast %63 : vector<1x256xf32> to vector<16x256xf32>
    %66 = arith.mulf %62, %65 : vector<16x256xf32>
    %cst_19 = arith.constant dense<0.000000e+00> : vector<16xf32>
    %67 = vector.multi_reduction <add>, %66, %cst_19 [1] : vector<16x256xf32> to vector<16xf32>
    %68 = vector.shape_cast %67 : vector<16xf32> to vector<16x1xf32>
    %69 = vector.broadcast %64 : vector<1x1xf32> to vector<16x1xf32>
    %70 = arith.addf %68, %69 : vector<16x1xf32>
    %c0_20 = arith.constant 0 : index
    %c0_21 = arith.constant 0 : index
    %71 = vector.load %arg3[%c0_20, %c0_21] : memref<16x1xf32, #tpu.memory_space<vmem>>, vector<16x1xf32>
    tpu.vector_store %arg3[%c0_20, %c0_21], %70 {strides = array<i32>} : memref<16x1xf32, #tpu.memory_space<vmem>>, vector<16x1xf32>,
    return
  }
}

</mosaic_0001>

<bundles_post_ra>
// kernel: stance_forward.1
= control target key start
LH: loop header
LB: loop body
LE: loop exit
PB: predicated region body
PF: predicated region fallthrough
CT: control target
= control target key end

     0   :  { %8 = vsyncpa [#allocation3], 0  ;;  %s3956_s0 = inlined_call_operand.vmem [shape: f32[16,3072], index: 0, kind: input, shape index: {}]   ;;  %s3957_s1 = inlined_call_operand.hbm [shape: bf16[768,1024], index: 1, kind: input, shape index: {}]   ;;  %s3958_s2 = inlined_call_operand.hbm [shape: f32[8,256], index: 2, kind: input, shape index: {}]   ;;  %s3959_s3 = inlined_call_operand.vmem [shape: f32[16,1], index: 3, kind: output, shape index: {}]  }
   0x1   :  { %9 = vsyncpa [#allocation5], 0  ;;  %s3724_s12 = smov [#allocation2]  }
   0x2   :  { %s17_s13 = sshll.u32 %s3724_s12, 4  ;;  %s18_s13 = int_to_ptr.vmem [resolvable:$true] %s17_s13 }
   0x3   :  { %s3688_s14 = scalar_lea.vmem %s18_s13, 49152  ;;  %p3693_p1 = scmp.lt.s32.totalorder %s18_s13, %s18_s13 }
   0x4   :  { %p3689_p0 = scmp.ne.s32.totalorder %s18_s13, %s3688_s14  ;;  %p3694_p2 = scmp.lt.s32.totalorder %s3688_s14, %s3688_s14 }
   0x6   :  { %p3695_p3 = por %p3694_p2, %p3693_p1 }
   0x8   :  { %p3696_p4 = pnand %p3695_p3, %p3689_p0 }
   0xa   :  { %3699 = shalt.err (!%p3696_p4)
}
   0xb   :  { %s3725_s15 = smov 512   ;;  %s3726_s16 = smov 32  }
   0xc   :  { %23 = dma.hbm_to_vmem [thread:$0]  %s3957_s1, 49152, %s18_s13, [#allocation3], %s3725_s15, %s3725_s15, %s3726_s16  }
   0xd   :  { %s3727_s19 = smov [#allocation4]  }
   0xe   :  { %s30_s20 = sshll.u32 %s3727_s19, 4  ;;  %s31_s20 = int_to_ptr.vmem [resolvable:$true] %s30_s20 }
   0xf   :  { %s3708_s21 = scalar_lea.vmem %s31_s20, 256  ;;  %p3713_p6 = scmp.lt.s32.totalorder %s31_s20, %s31_s20 }
  0x10   :  { %p3709_p5 = scmp.ne.s32.totalorder %s31_s20, %s3708_s21  ;;  %p3714_p7 = scmp.lt.s32.totalorder %s3708_s21, %s3708_s21 }
  0x12   :  { %p3715_p8 = por %p3714_p7, %p3713_p6 }
  0x14   :  { %p3716_p9 = pnand %p3715_p8, %p3709_p5 }
  0x16   :  { %3719 = shalt.err (!%p3716_p9)
}
  0x17   :  { %33 = dma.hbm_to_vmem [thread:$0]  %s3958_s2, 256, %s31_s20, [#allocation5]  }
  0x18   :  { %3720 = dma.done.wait [#allocation3], 49152  }
  0x19   :  { %3721 = vsyncadd [#allocation3], 4294918144 }
  0x1a   :  { %3722 = dma.done.wait [#allocation5], 256  }
  0x1b   :  { %3723 = vsyncadd [#allocation5], 4294967040  ;;  %v148_v0 = vld [vmem:[#allocation2 + $0x1c0] sm:$0xff]  ;;  %v41_v54 = vld [vmem:[%s3956_s0 + $0x8] sm:$0xff]  ;;  %vm3131_vm0 = vcmask 7168  }
  0x1c   :  { %v152_v1 = vld [vmem:[#allocation2 + $0x1e0] sm:$0xff]  ;;  %v45_v55 = vld [vmem:[%s3956_s0 + $0xc8] sm:$0xff]  ;;  %v43_v59 = vld [vmem:[%s3956_s0 + $0x18] sm:$0xff] }
  0x1d   :  { %v276_v2 = vld [vmem:[#allocation2 + $0x5c0] sm:$0xff]  ;;  %v3197_v3 = vcombine.high %v148_v0, %v152_v1  ;;  %v3196_v5 = vcombine.low %v148_v0, %v152_v1  ;;  %v3760_v58 = vpack.c.bf16 %v45_v55, %v41_v54  ;;  %v47_v60 = vld [vmem:[%s3956_s0 + $0xd8] sm:$0xff] }
  0x1e   :  { %v280_v4 = vld [vmem:[#allocation2 + $0x5e0] sm:$0xff]  ;;  %v3768_v63 = vpack.c.bf16 %v47_v60, %v43_v59 }
  0x1f   :  { %v140_v6 = vld [vmem:[#allocation2 + $0x180] sm:$0xff]  ;;  %v3325_v8 = vcombine.high %v276_v2, %v280_v4  ;;  %v3324_v9 = vcombine.low %v276_v2, %v280_v4  ;;  %1756 = vmatprep.subr.bf16.mxu0 %v3197_v3  ;;  %1788 = vmatprep.mubr.bf16.mxu0 %v3760_v58 }
  0x20   :  { %v144_v7 = vld [vmem:[#allocation2 + $0x1a0] sm:$0xff]  ;;  %1757 = vmatpush1.bf16.msra.mxu0 %v3196_v5  ;;  %1831 = vmatprep.mubr.bf16.mxu1 %v3768_v63 }
  0x21   :  { %v3189_v10 = vcombine.high %v140_v6, %v144_v7  ;;  %v268_v11 = vld [vmem:[#allocation2 + $0x580] sm:$0xff]  ;;  %1799 = vmatprep.subr.bf16.mxu1 %v3325_v8  ;;  %v3188_v18 = vcombine.low %v140_v6, %v144_v7 }
  0x22   :  { %v272_v12 = vld [vmem:[#allocation2 + $0x5a0] sm:$0xff]  ;;  %1800 = vmatpush1.bf16.msra.mxu1 %v3324_v9 }
  0x23   :  { %v132_v13 = vld [vmem:[#allocation2 + $0x140] sm:$0xff]  ;;  %v3317_v14 = vcombine.high %v268_v11, %v272_v12  ;;  %1758 = vmatprep.subr.bf16.mxu0 %v3189_v10  ;;  %v3316_v19 = vcombine.low %v268_v11, %v272_v12 }
  0x24   :  { %v136_v15 = vld [vmem:[#allocation2 + $0x160] sm:$0xff]  ;;  %1759 = vmatpush1.bf16.msra.mxu0 %v3188_v18 }
  0x25   :  { %v260_v16 = vld [vmem:[#allocation2 + $0x540] sm:$0xff]  ;;  %v3181_v20 = vcombine.high %v132_v13, %v136_v15  ;;  %1801 = vmatprep.subr.bf16.mxu1 %v3317_v14  ;;  %v3180_v26 = vcombine.low %v132_v13, %v136_v15 }
  0x26   :  { %v264_v17 = vld [vmem:[#allocation2 + $0x560] sm:$0xff]  ;;  %1802 = vmatpush1.bf16.msra.mxu1 %v3316_v19 }
  0x27   :  { %v3309_v21 = vcombine.high %v260_v16, %v264_v17  ;;  %v124_v22 = vld [vmem:[#allocation2 + $0x100] sm:$0xff]  ;;  %1760 = vmatprep.subr.bf16.mxu0 %v3181_v20  ;;  %v3308_v27 = vcombine.low %v260_v16, %v264_v17 }
  0x28   :  { %v128_v23 = vld [vmem:[#allocation2 + $0x120] sm:$0xff]  ;;  %1761 = vmatpush1.bf16.msra.mxu0 %v3180_v26 }
  0x29   :  { %v252_v24 = vld [vmem:[#allocation2 + $0x500] sm:$0xff]  ;;  %v3173_v28 = vcombine.high %v124_v22, %v128_v23  ;;  %1803 = vmatprep.subr.bf16.mxu1 %v3309_v21  ;;  %v3172_v34 = vcombine.low %v124_v22, %v128_v23 }
  0x2a   :  { %v256_v25 = vld [vmem:[#allocation2 + $0x520] sm:$0xff]  ;;  %1804 = vmatpush1.bf16.msra.mxu1 %v3308_v27 }
  0x2b   :  { %v3301_v29 = vcombine.high %v252_v24, %v256_v25  ;;  %v116_v30 = vld [vmem:[#allocation2 + $0xc0] sm:$0xff]  ;;  %1762 = vmatprep.subr.bf16.mxu0 %v3173_v28  ;;  %v3300_v35 = vcombine.low %v252_v24, %v256_v25 }
  0x2c   :  { %v120_v31 = vld [vmem:[#allocation2 + $0xe0] sm:$0xff]  ;;  %1763 = vmatpush1.bf16.msra.mxu0 %v3172_v34 }
  0x2d   :  { %v244_v32 = vld [vmem:[#allocation2 + $0x4c0] sm:$0xff]  ;;  %v3165_v36 = vcombine.high %v116_v30, %v120_v31  ;;  %1805 = vmatprep.subr.bf16.mxu1 %v3301_v29  ;;  %v3164_v42 = vcombine.low %v116_v30, %v120_v31 }
  0x2e   :  { %v248_v33 = vld [vmem:[#allocation2 + $0x4e0] sm:$0xff]  ;;  %1806 = vmatpush1.bf16.msra.mxu1 %v3300_v35 }
  0x2f   :  { %v3293_v37 = vcombine.high %v244_v32, %v248_v33  ;;  %v108_v38 = vld [vmem:[#allocation2 + $0x80] sm:$0xff]  ;;  %1764 = vmatprep.subr.bf16.mxu0 %v3165_v36  ;;  %v3292_v43 = vcombine.low %v244_v32, %v248_v33 }
  0x30   :  { %v112_v39 = vld [vmem:[#allocation2 + $0xa0] sm:$0xff]  ;;  %1765 = vmatpush1.bf16.msra.mxu0 %v3164_v42 }
  0x31   :  { %v236_v40 = vld [vmem:[#allocation2 + $0x480] sm:$0xff]  ;;  %v3157_v44 = vcombine.high %v108_v38, %v112_v39  ;;  %1807 = vmatprep.subr.bf16.mxu1 %v3293_v37  ;;  %v3156_v50 = vcombine.low %v108_v38, %v112_v39 }
  0x32   :  { %v240_v41 = vld [vmem:[#allocation2 + $0x4a0] sm:$0xff]  ;;  %1808 = vmatpush1.bf16.msra.mxu1 %v3292_v43 }
  0x33   :  { %v3285_v45 = vcombine.high %v236_v40, %v240_v41  ;;  %v100_v46 = vld [vmem:[#allocation2 + $0x40] sm:$0xff]  ;;  %1766 = vmatprep.subr.bf16.mxu0 %v3157_v44  ;;  %v3284_v51 = vcombine.low %v236_v40, %v240_v41 }
  0x34   :  { %v104_v47 = vld [vmem:[#allocation2 + $0x60] sm:$0xff]  ;;  %1767 = vmatpush1.bf16.msra.mxu0 %v3156_v50 }
  0x35   :  { %v228_v48 = vld [vmem:[#allocation2 + $0x440] sm:$0xff]  ;;  %v3149_v52 = vcombine.high %v100_v46, %v104_v47  ;;  %1809 = vmatprep.subr.bf16.mxu1 %v3285_v45  ;;  %v3148_v0 = vcombine.low %v100_v46, %v104_v47 }
  0x36   :  { %v232_v49 = vld [vmem:[#allocation2 + $0x460] sm:$0xff]  ;;  %1810 = vmatpush1.bf16.msra.mxu1 %v3284_v51 }
  0x37   :  { %v92_v53 = vld [vmem:[#allocation2] sm:$0xff]  ;;  %v3277_v56 = vcombine.high %v228_v48, %v232_v49  ;;  %1768 = vmatprep.subr.bf16.mxu0 %v3149_v52  ;;  %v3276_v1 = vcombine.low %v228_v48, %v232_v49 }
  0x38   :  { %v96_v57 = vld [vmem:[#allocation2 + $0x20] sm:$0xff]  ;;  %1769 = vmatpush1.bf16.msra.mxu0 %v3148_v0 }
  0x39   :  { %v220_v61 = vld [vmem:[#allocation2 + $0x400] sm:$0xff]  ;;  %v3141_v2 = vcombine.high %v92_v53, %v96_v57  ;;  %1811 = vmatprep.subr.bf16.mxu1 %v3277_v56  ;;  %v3140_v8 = vcombine.low %v92_v53, %v96_v57 }
  0x3a   :  { %v224_v62 = vld [vmem:[#allocation2 + $0x420] sm:$0xff]  ;;  %1812 = vmatpush1.bf16.msra.mxu1 %v3276_v1 }
  0x3b   :  { %v3269_v3 = vcombine.high %v220_v61, %v224_v62  ;;  %v212_v4 = vld [vmem:[#allocation2 + $0x3c0] sm:$0xff]  ;;  %1770 = vmatprep.subr.bf16.mxu0 %v3141_v2  ;;  %v3268_v9 = vcombine.low %v220_v61, %v224_v62 }
  0x3c   :  { %v216_v5 = vld [vmem:[#allocation2 + $0x3e0] sm:$0xff]  ;;  %1771 = vmatpush1.bf16.msra.mxu0 %v3140_v8  ;;  %v277_v8 = vld [vmem:[#allocation2 + $0x5c8] sm:$0xff] }
  0x3d   :  { %v340_v6 = vld [vmem:[#allocation2 + $0x7c0] sm:$0xff]  ;;  %v3261_v10 = vcombine.high %v212_v4, %v216_v5  ;;  %1813 = vmatprep.subr.bf16.mxu1 %v3269_v3  ;;  %v3260_v16 = vcombine.low %v212_v4, %v216_v5 }
  0x3e   :  { %v344_v7 = vld [vmem:[#allocation2 + $0x7e0] sm:$0xff]  ;;  %1814 = vmatpush1.bf16.msra.mxu1 %v3268_v9  ;;  %v281_v9 = vld [vmem:[#allocation2 + $0x5e8] sm:$0xff] }
  0x3f   :  { %v3389_v11 = vcombine.high %v340_v6, %v344_v7  ;;  %v204_v12 = vld [vmem:[#allocation2 + $0x380] sm:$0xff]  ;;  %1772 = vmatprep.subr.bf16.mxu0 %v3261_v10  ;;  %v3388_v17 = vcombine.low %v340_v6, %v344_v7  ;;  %v149_v6 = vld [vmem:[#allocation2 + $0x1c8] sm:$0xff] }
  0x40   :  { %v208_v13 = vld [vmem:[#allocation2 + $0x3a0] sm:$0xff]  ;;  %1773 = vmatpush2.bf16.msra.mxu0 %v3260_v16  ;;  %v153_v7 = vld [vmem:[#allocation2 + $0x1e8] sm:$0xff] }
  0x41   :  { %v332_v14 = vld [vmem:[#allocation2 + $0x780] sm:$0xff]  ;;  %v3253_v18 = vcombine.high %v204_v12, %v208_v13  ;;  %1815 = vmatprep.subr.bf16.mxu1 %v3389_v11  ;;  %v3252_v24 = vcombine.low %v204_v12, %v208_v13  ;;  %v3199_v16 = vcombine.high %v149_v6, %v153_v7 }
  0x42   :  { %v336_v15 = vld [vmem:[#allocation2 + $0x7a0] sm:$0xff]  ;;  %1816 = vmatpush2.bf16.msra.mxu1 %v3388_v17  ;;  %v3327_v17 = vcombine.high %v277_v8, %v281_v9 }
  0x43   :  { %v3381_v19 = vcombine.high %v332_v14, %v336_v15  ;;  %v196_v20 = vld [vmem:[#allocation2 + $0x340] sm:$0xff]  ;;  %1774 = vmatprep.subr.bf16.mxu0 %v3253_v18  ;;  %v3380_v25 = vcombine.low %v332_v14, %v336_v15  ;;  %v42_v14 = vld [vmem:[%s3956_s0 + $0x10] sm:$0xff]  ;;  %v141_v18 = vld [vmem:[#allocation2 + $0x188] sm:$0xff] }
  0x44   :  { %v200_v21 = vld [vmem:[#allocation2 + $0x360] sm:$0xff]  ;;  %1775 = vmatpush2.bf16.msra.mxu0 %v3252_v24  ;;  %v46_v15 = vld [vmem:[%s3956_s0 + $0xd0] sm:$0xff]  ;;  %v3198_v24 = vcombine.low %v149_v6, %v153_v7  ;;  %v93_v6 = vld [vmem:[#allocation2 + $0x8] sm:$0xff] }
  0x45   :  { %v324_v22 = vld [vmem:[#allocation2 + $0x740] sm:$0xff]  ;;  %v3245_v26 = vcombine.high %v196_v20, %v200_v21  ;;  %1817 = vmatprep.subr.bf16.mxu1 %v3381_v19  ;;  %v3244_v32 = vcombine.low %v196_v20, %v200_v21  ;;  %v145_v19 = vld [vmem:[#allocation2 + $0x1a8] sm:$0xff] }
  0x46   :  { %v328_v23 = vld [vmem:[#allocation2 + $0x760] sm:$0xff]  ;;  %1818 = vmatpush2.bf16.msra.mxu1 %v3380_v25  ;;  %v269_v21 = vld [vmem:[#allocation2 + $0x588] sm:$0xff]  ;;  %v3326_v25 = vcombine.low %v277_v8, %v281_v9 }
  0x47   :  { %v3373_v27 = vcombine.high %v324_v22, %v328_v23  ;;  %v188_v28 = vld [vmem:[#allocation2 + $0x300] sm:$0xff]  ;;  %1776 = vmatprep.subr.bf16.mxu0 %v3245_v26  ;;  %v3372_v33 = vcombine.low %v324_v22, %v328_v23  ;;  %v273_v22 = vld [vmem:[#allocation2 + $0x5a8] sm:$0xff]  ;;  %v3786_v23 = vpack.c.bf16 %v46_v15, %v42_v14  ;;  %v3191_v26 = vcombine.high %v141_v18, %v145_v19 }
  0x48   :  { %v192_v29 = vld [vmem:[#allocation2 + $0x320] sm:$0xff]  ;;  %1777 = vmatpush2.bf16.msra.mxu0 %v3244_v32  ;;  %v3190_v32 = vcombine.low %v141_v18, %v145_v19  ;;  %v97_v7 = vld [vmem:[#allocation2 + $0x28] sm:$0xff] }
  0x49   :  { %v316_v30 = vld [vmem:[#allocation2 + $0x700] sm:$0xff]  ;;  %v3237_v34 = vcombine.high %v188_v28, %v192_v29  ;;  %1819 = vmatprep.subr.bf16.mxu1 %v3373_v27  ;;  %v3236_v40 = vcombine.low %v188_v28, %v192_v29  ;;  %v3319_v27 = vcombine.high %v269_v21, %v273_v22  ;;  %v133_v28 = vld [vmem:[#allocation2 + $0x148] sm:$0xff]  ;;  %v3142_v18 = vcombine.low %v93_v6, %v97_v7 }
  0x4a   :  { %v320_v31 = vld [vmem:[#allocation2 + $0x720] sm:$0xff]  ;;  %1820 = vmatpush2.bf16.msra.mxu1 %v3372_v33  ;;  %v137_v29 = vld [vmem:[#allocation2 + $0x168] sm:$0xff]  ;;  %v3318_v33 = vcombine.low %v269_v21, %v273_v22 }
  0x4b   :  { %v3365_v35 = vcombine.high %v316_v30, %v320_v31  ;;  %v180_v36 = vld [vmem:[#allocation2 + $0x2c0] sm:$0xff]  ;;  %1778 = vmatprep.subr.bf16.mxu0 %v3237_v34  ;;  %v3364_v41 = vcombine.low %v316_v30, %v320_v31  ;;  %v261_v30 = vld [vmem:[#allocation2 + $0x548] sm:$0xff]  ;;  %v3183_v34 = vcombine.high %v133_v28, %v137_v29 }
  0x4c   :  { %v184_v37 = vld [vmem:[#allocation2 + $0x2e0] sm:$0xff]  ;;  %1779 = vmatpush2.bf16.msra.mxu0 %v3236_v40  ;;  %v265_v31 = vld [vmem:[#allocation2 + $0x568] sm:$0xff]  ;;  %v3182_v40 = vcombine.low %v133_v28, %v137_v29 }
  0x4d   :  { %v308_v38 = vld [vmem:[#allocation2 + $0x6c0] sm:$0xff]  ;;  %v3229_v42 = vcombine.high %v180_v36, %v184_v37  ;;  %1821 = vmatprep.subr.bf16.mxu1 %v3365_v35  ;;  %v3228_v48 = vcombine.low %v180_v36, %v184_v37  ;;  %v3311_v35 = vcombine.high %v261_v30, %v265_v31  ;;  %v125_v36 = vld [vmem:[#allocation2 + $0x108] sm:$0xff] }
  0x4e   :  { %v312_v39 = vld [vmem:[#allocation2 + $0x6e0] sm:$0xff]  ;;  %1822 = vmatpush2.bf16.msra.mxu1 %v3364_v41  ;;  %v129_v37 = vld [vmem:[#allocation2 + $0x128] sm:$0xff]  ;;  %v3310_v41 = vcombine.low %v261_v30, %v265_v31 }
  0x4f   :  { %v3357_v43 = vcombine.high %v308_v38, %v312_v39  ;;  %v172_v44 = vld [vmem:[#allocation2 + $0x280] sm:$0xff]  ;;  %1780 = vmatprep.subr.bf16.mxu0 %v3229_v42  ;;  %v3356_v49 = vcombine.low %v308_v38, %v312_v39  ;;  %v253_v38 = vld [vmem:[#allocation2 + $0x508] sm:$0xff]  ;;  %v3175_v42 = vcombine.high %v125_v36, %v129_v37 }
  0x50   :  { %v176_v45 = vld [vmem:[#allocation2 + $0x2a0] sm:$0xff]  ;;  %1781 = vmatpush2.bf16.msra.mxu0 %v3228_v48  ;;  %v257_v39 = vld [vmem:[#allocation2 + $0x528] sm:$0xff]  ;;  %v3174_v48 = vcombine.low %v125_v36, %v129_v37 }
  0x51   :  { %v300_v46 = vld [vmem:[#allocation2 + $0x680] sm:$0xff]  ;;  %v3221_v50 = vcombine.high %v172_v44, %v176_v45  ;;  %1823 = vmatprep.subr.bf16.mxu1 %v3357_v43  ;;  %v3220_v56 = vcombine.low %v172_v44, %v176_v45  ;;  %v3303_v43 = vcombine.high %v253_v38, %v257_v39  ;;  %v117_v44 = vld [vmem:[#allocation2 + $0xc8] sm:$0xff] }
  0x52   :  { %v304_v47 = vld [vmem:[#allocation2 + $0x6a0] sm:$0xff]  ;;  %1824 = vmatpush2.bf16.msra.mxu1 %v3356_v49  ;;  %v121_v45 = vld [vmem:[#allocation2 + $0xe8] sm:$0xff]  ;;  %v3302_v49 = vcombine.low %v253_v38, %v257_v39 }
  0x53   :  { %v3349_v51 = vcombine.high %v300_v46, %v304_v47  ;;  %v164_v52 = vld [vmem:[#allocation2 + $0x240] sm:$0xff]  ;;  %1782 = vmatprep.subr.bf16.mxu0 %v3221_v50  ;;  %v3348_v57 = vcombine.low %v300_v46, %v304_v47  ;;  %v245_v46 = vld [vmem:[#allocation2 + $0x4c8] sm:$0xff]  ;;  %v3167_v50 = vcombine.high %v117_v44, %v121_v45 }
  0x54   :  { %v168_v53 = vld [vmem:[#allocation2 + $0x260] sm:$0xff]  ;;  %1783 = vmatpush2.bf16.msra.mxu0 %v3220_v56  ;;  %v249_v47 = vld [vmem:[#allocation2 + $0x4e8] sm:$0xff]  ;;  %v3166_v56 = vcombine.low %v117_v44, %v121_v45 }
  0x55   :  { %v292_v54 = vld [vmem:[#allocation2 + $0x640] sm:$0xff]  ;;  %v3213_v59 = vcombine.high %v164_v52, %v168_v53  ;;  %1825 = vmatprep.subr.bf16.mxu1 %v3349_v51  ;;  %v3212_v2 = vcombine.low %v164_v52, %v168_v53  ;;  %v3295_v51 = vcombine.high %v245_v46, %v249_v47  ;;  %v109_v52 = vld [vmem:[#allocation2 + $0x88] sm:$0xff] }
  0x56   :  { %v296_v55 = vld [vmem:[#allocation2 + $0x660] sm:$0xff]  ;;  %1826 = vmatpush2.bf16.msra.mxu1 %v3348_v57  ;;  %v113_v53 = vld [vmem:[#allocation2 + $0xa8] sm:$0xff]  ;;  %v3294_v57 = vcombine.low %v245_v46, %v249_v47 }
  0x57   :  { %v3341_v60 = vcombine.high %v292_v54, %v296_v55  ;;  %v156_v61 = vld [vmem:[#allocation2 + $0x200] sm:$0xff]  ;;  %1784 = vmatprep.subr.bf16.mxu0 %v3213_v59  ;;  %v3340_v3 = vcombine.low %v292_v54, %v296_v55  ;;  %v237_v54 = vld [vmem:[#allocation2 + $0x488] sm:$0xff]  ;;  %v3159_v59 = vcombine.high %v109_v52, %v113_v53 }
  0x58   :  { %v160_v62 = vld [vmem:[#allocation2 + $0x220] sm:$0xff]  ;;  %1785 = vmatpush2.bf16.msra.mxu0 %v3212_v2  ;;  %v241_v55 = vld [vmem:[#allocation2 + $0x4a8] sm:$0xff]  ;;  %v3158_v2 = vcombine.low %v109_v52, %v113_v53 }
  0x59   :  { %v284_v0 = vld [vmem:[#allocation2 + $0x600] sm:$0xff]  ;;  %v3205_v4 = vcombine.high %v156_v61, %v160_v62  ;;  %1827 = vmatprep.subr.bf16.mxu1 %v3341_v60  ;;  %v3204_v10 = vcombine.low %v156_v61, %v160_v62  ;;  %v3287_v60 = vcombine.high %v237_v54, %v241_v55  ;;  %v101_v61 = vld [vmem:[#allocation2 + $0x48] sm:$0xff] }
  0x5a   :  { %v288_v1 = vld [vmem:[#allocation2 + $0x620] sm:$0xff]  ;;  %1828 = vmatpush2.bf16.msra.mxu1 %v3340_v3  ;;  %v105_v62 = vld [vmem:[#allocation2 + $0x68] sm:$0xff]  ;;  %v3286_v3 = vcombine.low %v237_v54, %v241_v55 }
  0x5b   :  { %v3333_v5 = vcombine.high %v284_v0, %v288_v1  ;;  %v40_v11 = vld [vmem:[%s3956_s0] sm:$0xff]  ;;  %1786 = vmatprep.subr.bf16.mxu0 %v3205_v4  ;;  %v3332_v13 = vcombine.low %v284_v0, %v288_v1  ;;  %v229_v0 = vld [vmem:[#allocation2 + $0x448] sm:$0xff]  ;;  %v3151_v4 = vcombine.high %v101_v61, %v105_v62 }
  0x5c   :  { %v44_v12 = vld [vmem:[%s3956_s0 + $0xc0] sm:$0xff]  ;;  %1787 = vmatpush2.bf16.msra.mxu0 %v3204_v10  ;;  %v233_v1 = vld [vmem:[#allocation2 + $0x468] sm:$0xff]  ;;  %v3150_v10 = vcombine.low %v101_v61, %v105_v62 }
  0x5d   :  { %1829 = vmatprep.subr.bf16.mxu1 %v3333_v5  ;;  %v3784_v20 = vpack.c.bf16 %v44_v12, %v40_v11  ;;  %1842 = vmatprep.subr.bf16.mxu0 %v3199_v16  ;;  %v3279_v5 = vcombine.high %v229_v0, %v233_v1  ;;  %v221_v8 = vld [vmem:[#allocation2 + $0x408] sm:$0xff]  ;;  %v3278_v11 = vcombine.low %v229_v0, %v233_v1 }
  0x5e   :  { %1830 = vmatpush2.bf16.msra.mxu1 %v3332_v13  ;;  %v225_v9 = vld [vmem:[#allocation2 + $0x428] sm:$0xff]  ;;  %v3143_v12 = vcombine.high %v93_v6, %v97_v7 }
  0x5f   :  { %1885 = vmatprep.subr.bf16.mxu1 %v3327_v17  ;;  %1789 = vmatmul.mubr.bf16.vlgmr.msra.gmra.mxu0 %v3784_v20  ;;  %v3271_v13 = vcombine.high %v221_v8, %v225_v9  ;;  %v213_v14 = vld [vmem:[#allocation2 + $0x3c8] sm:$0xff]  ;;  %v3270_v19 = vcombine.low %v221_v8, %v225_v9 }
  0x60   :  { %1843 = vmatpush1.bf16.msra.mxu0 %v3198_v24  ;;  %1874 = vmatprep.mubr.bf16.mxu0 %v3760_v58  ;;  %v217_v15 = vld [vmem:[#allocation2 + $0x3e8] sm:$0xff] }
  0x61   :  { %1832 = vmatmul.mubr.bf16.vlgmr.msra.gmra.mxu1 %v3786_v23  ;;  %1844 = vmatprep.subr.bf16.mxu0 %v3191_v26  ;;  %v341_v16 = vld [vmem:[#allocation2 + $0x7c8] sm:$0xff]  ;;  %v3263_v21 = vcombine.high %v213_v14, %v217_v15  ;;  %v3262_v28 = vcombine.low %v213_v14, %v217_v15 }
  0x62   :  { %1886 = vmatpush1.bf16.msra.mxu1 %v3326_v25  ;;  %1917 = vmatprep.mubr.bf16.mxu1 %v3768_v63  ;;  %v345_v17 = vld [vmem:[#allocation2 + $0x7e8] sm:$0xff] }
  0x63   :  { %1887 = vmatprep.subr.bf16.mxu1 %v3319_v27  ;;  %v3391_v22 = vcombine.high %v341_v16, %v345_v17  ;;  %v205_v24 = vld [vmem:[#allocation2 + $0x388] sm:$0xff]  ;;  %v3390_v29 = vcombine.low %v341_v16, %v345_v17 }
  0x64   :  { %1845 = vmatpush1.bf16.msra.mxu0 %v3190_v32  ;;  %v209_v25 = vld [vmem:[#allocation2 + $0x3a8] sm:$0xff] }
  0x65   :  { %1846 = vmatprep.subr.bf16.mxu0 %v3183_v34  ;;  %v333_v26 = vld [vmem:[#allocation2 + $0x788] sm:$0xff]  ;;  %v3255_v30 = vcombine.high %v205_v24, %v209_v25  ;;  %v3254_v36 = vcombine.low %v205_v24, %v209_v25 }
  0x66   :  { %1888 = vmatpush1.bf16.msra.mxu1 %v3318_v33  ;;  %v337_v27 = vld [vmem:[#allocation2 + $0x7a8] sm:$0xff] }
  0x67   :  { %1889 = vmatprep.subr.bf16.mxu1 %v3311_v35  ;;  %v3383_v31 = vcombine.high %v333_v26, %v337_v27  ;;  %v197_v32 = vld [vmem:[#allocation2 + $0x348] sm:$0xff]  ;;  %v3382_v37 = vcombine.low %v333_v26, %v337_v27 }
  0x68   :  { %1847 = vmatpush1.bf16.msra.mxu0 %v3182_v40  ;;  %v201_v33 = vld [vmem:[#allocation2 + $0x368] sm:$0xff] }
  0x69   :  { %1848 = vmatprep.subr.bf16.mxu0 %v3175_v42  ;;  %v325_v34 = vld [vmem:[#allocation2 + $0x748] sm:$0xff]  ;;  %v3247_v38 = vcombine.high %v197_v32, %v201_v33  ;;  %v3246_v44 = vcombine.low %v197_v32, %v201_v33 }
  0x6a   :  { %1890 = vmatpush1.bf16.msra.mxu1 %v3310_v41  ;;  %v329_v35 = vld [vmem:[#allocation2 + $0x768] sm:$0xff] }
  0x6b   :  { %1891 = vmatprep.subr.bf16.mxu1 %v3303_v43  ;;  %v3375_v39 = vcombine.high %v325_v34, %v329_v35  ;;  %v189_v40 = vld [vmem:[#allocation2 + $0x308] sm:$0xff]  ;;  %v3374_v45 = vcombine.low %v325_v34, %v329_v35 }
  0x6c   :  { %1849 = vmatpush1.bf16.msra.mxu0 %v3174_v48  ;;  %v193_v41 = vld [vmem:[#allocation2 + $0x328] sm:$0xff] }
  0x6d   :  { %1850 = vmatprep.subr.bf16.mxu0 %v3167_v50  ;;  %v317_v42 = vld [vmem:[#allocation2 + $0x708] sm:$0xff]  ;;  %v3239_v46 = vcombine.high %v189_v40, %v193_v41  ;;  %v3238_v52 = vcombine.low %v189_v40, %v193_v41 }
  0x6e   :  { %1892 = vmatpush1.bf16.msra.mxu1 %v3302_v49  ;;  %v321_v43 = vld [vmem:[#allocation2 + $0x728] sm:$0xff] }
  0x6f   :  { %1893 = vmatprep.subr.bf16.mxu1 %v3295_v51  ;;  %v3367_v47 = vcombine.high %v317_v42, %v321_v43  ;;  %v181_v48 = vld [vmem:[#allocation2 + $0x2c8] sm:$0xff]  ;;  %v3366_v53 = vcombine.low %v317_v42, %v321_v43 }
  0x70   :  { %1851 = vmatpush1.bf16.msra.mxu0 %v3166_v56  ;;  %v185_v49 = vld [vmem:[#allocation2 + $0x2e8] sm:$0xff] }
  0x71   :  { %1852 = vmatprep.subr.bf16.mxu0 %v3159_v59  ;;  %v309_v50 = vld [vmem:[#allocation2 + $0x6c8] sm:$0xff]  ;;  %v3231_v54 = vcombine.high %v181_v48, %v185_v49  ;;  %v3230_v61 = vcombine.low %v181_v48, %v185_v49 }
  0x72   :  { %1894 = vmatpush1.bf16.msra.mxu1 %v3294_v57  ;;  %v313_v51 = vld [vmem:[#allocation2 + $0x6e8] sm:$0xff] }
  0x73   :  { %1895 = vmatprep.subr.bf16.mxu1 %v3287_v60  ;;  %v3359_v55 = vcombine.high %v309_v50, %v313_v51  ;;  %v173_v56 = vld [vmem:[#allocation2 + $0x288] sm:$0xff]  ;;  %v3358_v62 = vcombine.low %v309_v50, %v313_v51 }
  0x74   :  { %1853 = vmatpush1.bf16.msra.mxu0 %v3158_v2  ;;  %v177_v57 = vld [vmem:[#allocation2 + $0x2a8] sm:$0xff] }
  0x75   :  { %1854 = vmatprep.subr.bf16.mxu0 %v3151_v4  ;;  %v301_v59 = vld [vmem:[#allocation2 + $0x688] sm:$0xff]  ;;  %v3223_v0 = vcombine.high %v173_v56, %v177_v57  ;;  %v3222_v6 = vcombine.low %v173_v56, %v177_v57 }
  0x76   :  { %1896 = vmatpush1.bf16.msra.mxu1 %v3286_v3  ;;  %v305_v60 = vld [vmem:[#allocation2 + $0x6a8] sm:$0xff] }
  0x77   :  { %1897 = vmatprep.subr.bf16.mxu1 %v3279_v5  ;;  %v3351_v1 = vcombine.high %v301_v59, %v305_v60  ;;  %v165_v2 = vld [vmem:[#allocation2 + $0x248] sm:$0xff]  ;;  %v3350_v7 = vcombine.low %v301_v59, %v305_v60 }
  0x78   :  { %1855 = vmatpush1.bf16.msra.mxu0 %v3150_v10  ;;  %v169_v3 = vld [vmem:[#allocation2 + $0x268] sm:$0xff] }
  0x79   :  { %1856 = vmatprep.subr.bf16.mxu0 %v3143_v12  ;;  %v293_v4 = vld [vmem:[#allocation2 + $0x648] sm:$0xff]  ;;  %v3215_v8 = vcombine.high %v165_v2, %v169_v3  ;;  %v3214_v14 = vcombine.low %v165_v2, %v169_v3 }
  0x7a   :  { %1898 = vmatpush1.bf16.msra.mxu1 %v3278_v11  ;;  %v297_v5 = vld [vmem:[#allocation2 + $0x668] sm:$0xff] }
  0x7b   :  { %1899 = vmatprep.subr.bf16.mxu1 %v3271_v13  ;;  %v3343_v9 = vcombine.high %v293_v4, %v297_v5  ;;  %v157_v10 = vld [vmem:[#allocation2 + $0x208] sm:$0xff]  ;;  %v3342_v15 = vcombine.low %v293_v4, %v297_v5 }
  0x7c   :  { %1857 = vmatpush1.bf16.msra.mxu0 %v3142_v18  ;;  %v161_v11 = vld [vmem:[#allocation2 + $0x228] sm:$0xff]  ;;  %v150_v18 = vld [vmem:[#allocation2 + $0x1d0] sm:$0xff] }
  0x7d   :  { %1858 = vmatprep.subr.bf16.mxu0 %v3263_v21  ;;  %v285_v12 = vld [vmem:[#allocation2 + $0x608] sm:$0xff]  ;;  %v3207_v16 = vcombine.high %v157_v10, %v161_v11  ;;  %v278_v21 = vld [vmem:[#allocation2 + $0x5d0] sm:$0xff]  ;;  %v3206_v24 = vcombine.low %v157_v10, %v161_v11 }
  0x7e   :  { %1900 = vmatpush1.bf16.msra.mxu1 %v3270_v19  ;;  %v289_v13 = vld [vmem:[#allocation2 + $0x628] sm:$0xff]  ;;  %v154_v19 = vld [vmem:[#allocation2 + $0x1f0] sm:$0xff] }
  0x7f   :  { %1901 = vmatprep.subr.bf16.mxu1 %v3391_v22  ;;  %v3335_v17 = vcombine.high %v285_v12, %v289_v13  ;;  %v282_v22 = vld [vmem:[#allocation2 + $0x5f0] sm:$0xff]  ;;  %v3334_v25 = vcombine.low %v285_v12, %v289_v13  ;;  %v3201_v26 = vcombine.high %v150_v18, %v154_v19  ;;  %v3200_v32 = vcombine.low %v150_v18, %v154_v19 }
  0x80   :  { %1859 = vmatpush2.bf16.msra.mxu0 %v3262_v28  ;;  %v3329_v27 = vcombine.high %v278_v21, %v282_v22  ;;  %v142_v28 = vld [vmem:[#allocation2 + $0x190] sm:$0xff]  ;;  %v3328_v33 = vcombine.low %v278_v21, %v282_v22 }
  0x81   :  { %1860 = vmatprep.subr.bf16.mxu0 %v3255_v30  ;;  %v270_v30 = vld [vmem:[#allocation2 + $0x590] sm:$0xff] }
  0x82   :  { %1902 = vmatpush2.bf16.msra.mxu1 %v3390_v29  ;;  %v146_v29 = vld [vmem:[#allocation2 + $0x1b0] sm:$0xff] }
  0x83   :  { %1903 = vmatprep.subr.bf16.mxu1 %v3383_v31  ;;  %v274_v31 = vld [vmem:[#allocation2 + $0x5b0] sm:$0xff]  ;;  %v3193_v34 = vcombine.high %v142_v28, %v146_v29  ;;  %v3192_v40 = vcombine.low %v142_v28, %v146_v29 }
  0x84   :  { %1861 = vmatpush2.bf16.msra.mxu0 %v3254_v36  ;;  %v3321_v35 = vcombine.high %v270_v30, %v274_v31  ;;  %v134_v36 = vld [vmem:[#allocation2 + $0x150] sm:$0xff]  ;;  %v3320_v41 = vcombine.low %v270_v30, %v274_v31 }
  0x85   :  { %1862 = vmatprep.subr.bf16.mxu0 %v3247_v38  ;;  %v262_v38 = vld [vmem:[#allocation2 + $0x550] sm:$0xff] }
  0x86   :  { %1904 = vmatpush2.bf16.msra.mxu1 %v3382_v37  ;;  %v138_v37 = vld [vmem:[#allocation2 + $0x170] sm:$0xff] }
  0x87   :  { %1905 = vmatprep.subr.bf16.mxu1 %v3375_v39  ;;  %v266_v39 = vld [vmem:[#allocation2 + $0x570] sm:$0xff]  ;;  %v3185_v42 = vcombine.high %v134_v36, %v138_v37  ;;  %v3184_v48 = vcombine.low %v134_v36, %v138_v37 }
  0x88   :  { %1863 = vmatpush2.bf16.msra.mxu0 %v3246_v44  ;;  %v3313_v43 = vcombine.high %v262_v38, %v266_v39  ;;  %v126_v44 = vld [vmem:[#allocation2 + $0x110] sm:$0xff]  ;;  %v3312_v49 = vcombine.low %v262_v38, %v266_v39 }
  0x89   :  { %1864 = vmatprep.subr.bf16.mxu0 %v3239_v46  ;;  %v254_v46 = vld [vmem:[#allocation2 + $0x510] sm:$0xff] }
  0x8a   :  { %1906 = vmatpush2.bf16.msra.mxu1 %v3374_v45  ;;  %v130_v45 = vld [vmem:[#allocation2 + $0x130] sm:$0xff] }
  0x8b   :  { %1907 = vmatprep.subr.bf16.mxu1 %v3367_v47  ;;  %v258_v47 = vld [vmem:[#allocation2 + $0x530] sm:$0xff]  ;;  %v3177_v50 = vcombine.high %v126_v44, %v130_v45  ;;  %v3176_v56 = vcombine.low %v126_v44, %v130_v45 }
  0x8c   :  { %1865 = vmatpush2.bf16.msra.mxu0 %v3238_v52  ;;  %v3305_v51 = vcombine.high %v254_v46, %v258_v47  ;;  %v118_v52 = vld [vmem:[#allocation2 + $0xd0] sm:$0xff]  ;;  %v3304_v57 = vcombine.low %v254_v46, %v258_v47 }
  0x8d   :  { %1866 = vmatprep.subr.bf16.mxu0 %v3231_v54  ;;  %v246_v54 = vld [vmem:[#allocation2 + $0x4d0] sm:$0xff] }
  0x8e   :  { %1908 = vmatpush2.bf16.msra.mxu1 %v3366_v53  ;;  %v122_v53 = vld [vmem:[#allocation2 + $0xf0] sm:$0xff] }
  0x8f   :  { %1909 = vmatprep.subr.bf16.mxu1 %v3359_v55  ;;  %v250_v55 = vld [vmem:[#allocation2 + $0x4f0] sm:$0xff]  ;;  %v3169_v59 = vcombine.high %v118_v52, %v122_v53  ;;  %v3168_v2 = vcombine.low %v118_v52, %v122_v53 }
  0x90   :  { %1867 = vmatpush2.bf16.msra.mxu0 %v3230_v61  ;;  %v3297_v60 = vcombine.high %v246_v54, %v250_v55  ;;  %v110_v61 = vld [vmem:[#allocation2 + $0x90] sm:$0xff]  ;;  %v3296_v3 = vcombine.low %v246_v54, %v250_v55 }
  0x91   :  { %1868 = vmatprep.subr.bf16.mxu0 %v3223_v0  ;;  %v238_v0 = vld [vmem:[#allocation2 + $0x490] sm:$0xff] }
  0x92   :  { %1910 = vmatpush2.bf16.msra.mxu1 %v3358_v62  ;;  %v114_v62 = vld [vmem:[#allocation2 + $0xb0] sm:$0xff] }
  0x93   :  { %1911 = vmatprep.subr.bf16.mxu1 %v3351_v1  ;;  %v242_v1 = vld [vmem:[#allocation2 + $0x4b0] sm:$0xff]  ;;  %v3161_v4 = vcombine.high %v110_v61, %v114_v62  ;;  %v3160_v10 = vcombine.low %v110_v61, %v114_v62 }
  0x94   :  { %1869 = vmatpush2.bf16.msra.mxu0 %v3222_v6  ;;  %v3289_v5 = vcombine.high %v238_v0, %v242_v1  ;;  %v102_v6 = vld [vmem:[#allocation2 + $0x50] sm:$0xff]  ;;  %v3288_v11 = vcombine.low %v238_v0, %v242_v1 }
  0x95   :  { %1870 = vmatprep.subr.bf16.mxu0 %v3215_v8  ;;  %v230_v8 = vld [vmem:[#allocation2 + $0x450] sm:$0xff] }
  0x96   :  { %1912 = vmatpush2.bf16.msra.mxu1 %v3350_v7  ;;  %v106_v7 = vld [vmem:[#allocation2 + $0x70] sm:$0xff] }
  0x97   :  { %1913 = vmatprep.subr.bf16.mxu1 %v3343_v9  ;;  %v234_v9 = vld [vmem:[#allocation2 + $0x470] sm:$0xff]  ;;  %v3153_v12 = vcombine.high %v102_v6, %v106_v7  ;;  %v3152_v18 = vcombine.low %v102_v6, %v106_v7 }
  0x98   :  { %1871 = vmatpush2.bf16.msra.mxu0 %v3214_v14  ;;  %v3281_v13 = vcombine.high %v230_v8, %v234_v9  ;;  %v94_v14 = vld [vmem:[#allocation2 + $0x10] sm:$0xff]  ;;  %v3280_v19 = vcombine.low %v230_v8, %v234_v9 }
  0x99   :  { %1872 = vmatprep.subr.bf16.mxu0 %v3207_v16  ;;  %v222_v16 = vld [vmem:[#allocation2 + $0x410] sm:$0xff] }
  0x9a   :  { %1914 = vmatpush2.bf16.msra.mxu1 %v3342_v15  ;;  %v98_v15 = vld [vmem:[#allocation2 + $0x30] sm:$0xff] }
  0x9b   :  { %1915 = vmatprep.subr.bf16.mxu1 %v3335_v17  ;;  %v226_v17 = vld [vmem:[#allocation2 + $0x430] sm:$0xff]  ;;  %v3145_v21 = vcombine.high %v94_v14, %v98_v15  ;;  %v3144_v28 = vcombine.low %v94_v14, %v98_v15 }
  0x9c   :  { %1873 = vmatpush2.bf16.msra.mxu0 %v3206_v24  ;;  %v3273_v22 = vcombine.high %v222_v16, %v226_v17  ;;  %v214_v24 = vld [vmem:[#allocation2 + $0x3d0] sm:$0xff]  ;;  %v3272_v29 = vcombine.low %v222_v16, %v226_v17 }
  0x9d   :  { %1928 = vmatprep.subr.bf16.mxu0 %v3201_v26  ;;  %v342_v26 = vld [vmem:[#allocation2 + $0x7d0] sm:$0xff] }
  0x9e   :  { %1916 = vmatpush2.bf16.msra.mxu1 %v3334_v25  ;;  %v218_v25 = vld [vmem:[#allocation2 + $0x3f0] sm:$0xff] }
  0x9f   :  { %1971 = vmatprep.subr.bf16.mxu1 %v3329_v27  ;;  %1875 = vmatmul.mubr.bf16.vlgmr.msra.gmra.mxu0 %v3784_v20  ;;  %v346_v27 = vld [vmem:[#allocation2 + $0x7f0] sm:$0xff]  ;;  %v3265_v30 = vcombine.high %v214_v24, %v218_v25  ;;  %v3264_v36 = vcombine.low %v214_v24, %v218_v25 }
  0xa0   :  { %1929 = vmatpush1.bf16.msra.mxu0 %v3200_v32  ;;  %1960 = vmatprep.mubr.bf16.mxu0 %v3760_v58  ;;  %v3393_v31 = vcombine.high %v342_v26, %v346_v27  ;;  %v206_v32 = vld [vmem:[#allocation2 + $0x390] sm:$0xff]  ;;  %v3392_v37 = vcombine.low %v342_v26, %v346_v27 }
  0xa1   :  { %1918 = vmatmul.mubr.bf16.vlgmr.msra.gmra.mxu1 %v3786_v23  ;;  %1930 = vmatprep.subr.bf16.mxu0 %v3193_v34  ;;  %v334_v34 = vld [vmem:[#allocation2 + $0x790] sm:$0xff] }
  0xa2   :  { %1972 = vmatpush1.bf16.msra.mxu1 %v3328_v33  ;;  %2003 = vmatprep.mubr.bf16.mxu1 %v3768_v63  ;;  %v210_v33 = vld [vmem:[#allocation2 + $0x3b0] sm:$0xff] }
  0xa3   :  { %1973 = vmatprep.subr.bf16.mxu1 %v3321_v35  ;;  %v338_v35 = vld [vmem:[#allocation2 + $0x7b0] sm:$0xff]  ;;  %v3257_v38 = vcombine.high %v206_v32, %v210_v33  ;;  %v3256_v44 = vcombine.low %v206_v32, %v210_v33 }
  0xa4   :  { %1931 = vmatpush1.bf16.msra.mxu0 %v3192_v40  ;;  %v3385_v39 = vcombine.high %v334_v34, %v338_v35  ;;  %v198_v40 = vld [vmem:[#allocation2 + $0x350] sm:$0xff]  ;;  %v3384_v45 = vcombine.low %v334_v34, %v338_v35 }
  0xa5   :  { %1932 = vmatprep.subr.bf16.mxu0 %v3185_v42  ;;  %v326_v42 = vld [vmem:[#allocation2 + $0x750] sm:$0xff] }
  0xa6   :  { %1974 = vmatpush1.bf16.msra.mxu1 %v3320_v41  ;;  %v202_v41 = vld [vmem:[#allocation2 + $0x370] sm:$0xff] }
  0xa7   :  { %1975 = vmatprep.subr.bf16.mxu1 %v3313_v43  ;;  %v330_v43 = vld [vmem:[#allocation2 + $0x770] sm:$0xff]  ;;  %v3249_v46 = vcombine.high %v198_v40, %v202_v41  ;;  %v3248_v52 = vcombine.low %v198_v40, %v202_v41 }
  0xa8   :  { %1933 = vmatpush1.bf16.msra.mxu0 %v3184_v48  ;;  %v3377_v47 = vcombine.high %v326_v42, %v330_v43  ;;  %v190_v48 = vld [vmem:[#allocation2 + $0x310] sm:$0xff]  ;;  %v3376_v53 = vcombine.low %v326_v42, %v330_v43 }
  0xa9   :  { %1934 = vmatprep.subr.bf16.mxu0 %v3177_v50  ;;  %v318_v50 = vld [vmem:[#allocation2 + $0x710] sm:$0xff] }
  0xaa   :  { %1976 = vmatpush1.bf16.msra.mxu1 %v3312_v49  ;;  %v194_v49 = vld [vmem:[#allocation2 + $0x330] sm:$0xff] }
  0xab   :  { %1977 = vmatprep.subr.bf16.mxu1 %v3305_v51  ;;  %v322_v51 = vld [vmem:[#allocation2 + $0x730] sm:$0xff]  ;;  %v3241_v54 = vcombine.high %v190_v48, %v194_v49  ;;  %v3240_v61 = vcombine.low %v190_v48, %v194_v49 }
  0xac   :  { %1935 = vmatpush1.bf16.msra.mxu0 %v3176_v56  ;;  %v3369_v55 = vcombine.high %v318_v50, %v322_v51  ;;  %v182_v56 = vld [vmem:[#allocation2 + $0x2d0] sm:$0xff]  ;;  %v3368_v62 = vcombine.low %v318_v50, %v322_v51 }
  0xad   :  { %1936 = vmatprep.subr.bf16.mxu0 %v3169_v59  ;;  %v310_v59 = vld [vmem:[#allocation2 + $0x6d0] sm:$0xff] }
  0xae   :  { %1978 = vmatpush1.bf16.msra.mxu1 %v3304_v57  ;;  %v186_v57 = vld [vmem:[#allocation2 + $0x2f0] sm:$0xff] }
  0xaf   :  { %1979 = vmatprep.subr.bf16.mxu1 %v3297_v60  ;;  %v314_v60 = vld [vmem:[#allocation2 + $0x6f0] sm:$0xff]  ;;  %v3233_v0 = vcombine.high %v182_v56, %v186_v57  ;;  %v3232_v6 = vcombine.low %v182_v56, %v186_v57 }
  0xb0   :  { %1937 = vmatpush1.bf16.msra.mxu0 %v3168_v2  ;;  %v3361_v1 = vcombine.high %v310_v59, %v314_v60  ;;  %v174_v2 = vld [vmem:[#allocation2 + $0x290] sm:$0xff]  ;;  %v3360_v7 = vcombine.low %v310_v59, %v314_v60 }
  0xb1   :  { %1938 = vmatprep.subr.bf16.mxu0 %v3161_v4  ;;  %v302_v4 = vld [vmem:[#allocation2 + $0x690] sm:$0xff] }
  0xb2   :  { %1980 = vmatpush1.bf16.msra.mxu1 %v3296_v3  ;;  %v178_v3 = vld [vmem:[#allocation2 + $0x2b0] sm:$0xff] }
  0xb3   :  { %1981 = vmatprep.subr.bf16.mxu1 %v3289_v5  ;;  %v306_v5 = vld [vmem:[#allocation2 + $0x6b0] sm:$0xff]  ;;  %v3225_v8 = vcombine.high %v174_v2, %v178_v3  ;;  %v3224_v14 = vcombine.low %v174_v2, %v178_v3 }
  0xb4   :  { %1939 = vmatpush1.bf16.msra.mxu0 %v3160_v10  ;;  %v3353_v9 = vcombine.high %v302_v4, %v306_v5  ;;  %v166_v10 = vld [vmem:[#allocation2 + $0x250] sm:$0xff]  ;;  %v3352_v15 = vcombine.low %v302_v4, %v306_v5  ;;  %v111_v4 = vld [vmem:[#allocation2 + $0x98] sm:$0xff] }
  0xb5   :  { %1940 = vmatprep.subr.bf16.mxu0 %v3153_v12  ;;  %v294_v12 = vld [vmem:[#allocation2 + $0x650] sm:$0xff]  ;;  %v115_v5 = vld [vmem:[#allocation2 + $0xb8] sm:$0xff] }
  0xb6   :  { %1982 = vmatpush1.bf16.msra.mxu1 %v3288_v11  ;;  %v170_v11 = vld [vmem:[#allocation2 + $0x270] sm:$0xff] }
  0xb7   :  { %1983 = vmatprep.subr.bf16.mxu1 %v3281_v13  ;;  %v298_v13 = vld [vmem:[#allocation2 + $0x670] sm:$0xff]  ;;  %v3217_v16 = vcombine.high %v166_v10, %v170_v11  ;;  %v3216_v24 = vcombine.low %v166_v10, %v170_v11  ;;  %v3163_v10 = vcombine.high %v111_v4, %v115_v5 }
  0xb8   :  { %1941 = vmatpush1.bf16.msra.mxu0 %v3152_v18  ;;  %v3345_v17 = vcombine.high %v294_v12, %v298_v13  ;;  %v158_v18 = vld [vmem:[#allocation2 + $0x210] sm:$0xff]  ;;  %v3344_v25 = vcombine.low %v294_v12, %v298_v13  ;;  %v103_v12 = vld [vmem:[#allocation2 + $0x58] sm:$0xff] }
  0xb9   :  { %1942 = vmatprep.subr.bf16.mxu0 %v3145_v21  ;;  %v286_v21 = vld [vmem:[#allocation2 + $0x610] sm:$0xff]  ;;  %v107_v13 = vld [vmem:[#allocation2 + $0x78] sm:$0xff] }
  0xba   :  { %1984 = vmatpush1.bf16.msra.mxu1 %v3280_v19  ;;  %v162_v19 = vld [vmem:[#allocation2 + $0x230] sm:$0xff] }
  0xbb   :  { %1985 = vmatprep.subr.bf16.mxu1 %v3273_v22  ;;  %v290_v22 = vld [vmem:[#allocation2 + $0x630] sm:$0xff]  ;;  %v3209_v26 = vcombine.high %v158_v18, %v162_v19  ;;  %v3208_v32 = vcombine.low %v158_v18, %v162_v19  ;;  %v3155_v18 = vcombine.high %v103_v12, %v107_v13 }
  0xbc   :  { %1943 = vmatpush1.bf16.msra.mxu0 %v3144_v28  ;;  %v3337_v27 = vcombine.high %v286_v21, %v290_v22  ;;  %v151_v28 = vld [vmem:[#allocation2 + $0x1d8] sm:$0xff]  ;;  %v3336_v33 = vcombine.low %v286_v21, %v290_v22 }
  0xbd   :  { %1944 = vmatprep.subr.bf16.mxu0 %v3265_v30  ;;  %v279_v30 = vld [vmem:[#allocation2 + $0x5d8] sm:$0xff] }
  0xbe   :  { %1986 = vmatpush1.bf16.msra.mxu1 %v3272_v29  ;;  %v155_v29 = vld [vmem:[#allocation2 + $0x1f8] sm:$0xff] }
  0xbf   :  { %1987 = vmatprep.subr.bf16.mxu1 %v3393_v31  ;;  %v283_v31 = vld [vmem:[#allocation2 + $0x5f8] sm:$0xff]  ;;  %v3203_v34 = vcombine.high %v151_v28, %v155_v29  ;;  %v3202_v40 = vcombine.low %v151_v28, %v155_v29 }
  0xc0   :  { %1945 = vmatpush2.bf16.msra.mxu0 %v3264_v36  ;;  %v3331_v35 = vcombine.high %v279_v30, %v283_v31  ;;  %v143_v36 = vld [vmem:[#allocation2 + $0x198] sm:$0xff]  ;;  %v3330_v41 = vcombine.low %v279_v30, %v283_v31 }
  0xc1   :  { %1946 = vmatprep.subr.bf16.mxu0 %v3257_v38  ;;  %v271_v38 = vld [vmem:[#allocation2 + $0x598] sm:$0xff] }
  0xc2   :  { %1988 = vmatpush2.bf16.msra.mxu1 %v3392_v37  ;;  %v147_v37 = vld [vmem:[#allocation2 + $0x1b8] sm:$0xff] }
  0xc3   :  { %1989 = vmatprep.subr.bf16.mxu1 %v3385_v39  ;;  %v275_v39 = vld [vmem:[#allocation2 + $0x5b8] sm:$0xff]  ;;  %v3195_v42 = vcombine.high %v143_v36, %v147_v37  ;;  %v3194_v48 = vcombine.low %v143_v36, %v147_v37 }
  0xc4   :  { %1947 = vmatpush2.bf16.msra.mxu0 %v3256_v44  ;;  %v3323_v43 = vcombine.high %v271_v38, %v275_v39  ;;  %v135_v44 = vld [vmem:[#allocation2 + $0x158] sm:$0xff]  ;;  %v3322_v49 = vcombine.low %v271_v38, %v275_v39 }
  0xc5   :  { %1948 = vmatprep.subr.bf16.mxu0 %v3249_v46  ;;  %v263_v46 = vld [vmem:[#allocation2 + $0x558] sm:$0xff] }
  0xc6   :  { %1990 = vmatpush2.bf16.msra.mxu1 %v3384_v45  ;;  %v139_v45 = vld [vmem:[#allocation2 + $0x178] sm:$0xff] }
  0xc7   :  { %1991 = vmatprep.subr.bf16.mxu1 %v3377_v47  ;;  %v267_v47 = vld [vmem:[#allocation2 + $0x578] sm:$0xff]  ;;  %v3187_v50 = vcombine.high %v135_v44, %v139_v45  ;;  %v3186_v56 = vcombine.low %v135_v44, %v139_v45 }
  0xc8   :  { %1949 = vmatpush2.bf16.msra.mxu0 %v3248_v52  ;;  %v3315_v51 = vcombine.high %v263_v46, %v267_v47  ;;  %v127_v52 = vld [vmem:[#allocation2 + $0x118] sm:$0xff]  ;;  %v3314_v57 = vcombine.low %v263_v46, %v267_v47 }
  0xc9   :  { %1950 = vmatprep.subr.bf16.mxu0 %v3241_v54  ;;  %v255_v54 = vld [vmem:[#allocation2 + $0x518] sm:$0xff] }
  0xca   :  { %1992 = vmatpush2.bf16.msra.mxu1 %v3376_v53  ;;  %v131_v53 = vld [vmem:[#allocation2 + $0x138] sm:$0xff] }
  0xcb   :  { %1993 = vmatprep.subr.bf16.mxu1 %v3369_v55  ;;  %v259_v55 = vld [vmem:[#allocation2 + $0x538] sm:$0xff]  ;;  %v3179_v59 = vcombine.high %v127_v52, %v131_v53  ;;  %v3178_v2 = vcombine.low %v127_v52, %v131_v53 }
  0xcc   :  { %1951 = vmatpush2.bf16.msra.mxu0 %v3240_v61  ;;  %v3307_v60 = vcombine.high %v255_v54, %v259_v55  ;;  %v119_v61 = vld [vmem:[#allocation2 + $0xd8] sm:$0xff] }
  0xcd   :  { %1952 = vmatprep.subr.bf16.mxu0 %v3233_v0  ;;  %v247_v0 = vld [vmem:[#allocation2 + $0x4d8] sm:$0xff] }
  0xce   :  { %1994 = vmatpush2.bf16.msra.mxu1 %v3368_v62  ;;  %v123_v62 = vld [vmem:[#allocation2 + $0xf8] sm:$0xff] }
  0xcf   :  { %1995 = vmatprep.subr.bf16.mxu1 %v3361_v1  ;;  %v251_v1 = vld [vmem:[#allocation2 + $0x4f8] sm:$0xff]  ;;  %v3171_v3 = vcombine.high %v119_v61, %v123_v62 }
  0xd0   :  { %1953 = vmatpush2.bf16.msra.mxu0 %v3232_v6  ;;  %v239_v6 = vld [vmem:[#allocation2 + $0x498] sm:$0xff] }
  0xd1   :  { %1954 = vmatprep.subr.bf16.mxu0 %v3225_v8  ;;  %v3170_v8 = vcombine.low %v119_v61, %v123_v62  ;;  %v95_v21 = vld [vmem:[#allocation2 + $0x18] sm:$0xff] }
  0xd2   :  { %1996 = vmatpush2.bf16.msra.mxu1 %v3360_v7  ;;  %v243_v7 = vld [vmem:[#allocation2 + $0x4b8] sm:$0xff] }
  0xd3   :  { %1997 = vmatprep.subr.bf16.mxu1 %v3353_v9  ;;  %v3298_v9 = vcombine.low %v247_v0, %v251_v1  ;;  %v3291_v11 = vcombine.high %v239_v6, %v243_v7  ;;  %v99_v22 = vld [vmem:[#allocation2 + $0x38] sm:$0xff] }
  0xd4   :  { %1955 = vmatpush2.bf16.msra.mxu0 %v3224_v14  ;;  %v231_v14 = vld [vmem:[#allocation2 + $0x458] sm:$0xff]  ;;  %v3147_v28 = vcombine.high %v95_v21, %v99_v22 }
  0xd5   :  { %1956 = vmatprep.subr.bf16.mxu0 %v3217_v16  ;;  %v3162_v16 = vcombine.low %v111_v4, %v115_v5  ;;  %v215_v30 = vld [vmem:[#allocation2 + $0x3d8] sm:$0xff] }
  0xd6   :  { %1998 = vmatpush2.bf16.msra.mxu1 %v3352_v15  ;;  %v235_v15 = vld [vmem:[#allocation2 + $0x478] sm:$0xff] }
  0xd7   :  { %1999 = vmatprep.subr.bf16.mxu1 %v3345_v17  ;;  %v3290_v17 = vcombine.low %v239_v6, %v243_v7  ;;  %v3283_v19 = vcombine.high %v231_v14, %v235_v15  ;;  %v219_v31 = vld [vmem:[#allocation2 + $0x3f8] sm:$0xff] }
  0xd8   :  { %1957 = vmatpush2.bf16.msra.mxu0 %v3216_v24  ;;  %v223_v24 = vld [vmem:[#allocation2 + $0x418] sm:$0xff]  ;;  %v3267_v36 = vcombine.high %v215_v30, %v219_v31 }
  0xd9   :  { %1958 = vmatprep.subr.bf16.mxu0 %v3209_v26  ;;  %v3154_v26 = vcombine.low %v103_v12, %v107_v13  ;;  %v207_v38 = vld [vmem:[#allocation2 + $0x398] sm:$0xff] }
  0xda   :  { %2000 = vmatpush2.bf16.msra.mxu1 %v3344_v25  ;;  %v227_v25 = vld [vmem:[#allocation2 + $0x438] sm:$0xff] }
  0xdb   :  { %2001 = vmatprep.subr.bf16.mxu1 %v3337_v27  ;;  %v3282_v27 = vcombine.low %v231_v14, %v235_v15  ;;  %v3275_v29 = vcombine.high %v223_v24, %v227_v25  ;;  %v211_v39 = vld [vmem:[#allocation2 + $0x3b8] sm:$0xff] }
  0xdc   :  { %1959 = vmatpush2.bf16.msra.mxu0 %v3208_v32  ;;  %v343_v32 = vld [vmem:[#allocation2 + $0x7d8] sm:$0xff]  ;;  %v3259_v44 = vcombine.high %v207_v38, %v211_v39 }
  0xdd   :  { %2014 = vmatprep.subr.bf16.mxu0 %v3203_v34  ;;  %v3146_v34 = vcombine.low %v95_v21, %v99_v22  ;;  %v199_v46 = vld [vmem:[#allocation2 + $0x358] sm:$0xff] }
  0xde   :  { %2002 = vmatpush2.bf16.msra.mxu1 %v3336_v33  ;;  %v347_v33 = vld [vmem:[#allocation2 + $0x7f8] sm:$0xff] }
  0xdf   :  { %2057 = vmatprep.subr.bf16.mxu1 %v3331_v35  ;;  %1961 = vmatmul.mubr.bf16.vlgmr.msra.gmra.mxu0 %v3784_v20  ;;  %v3274_v35 = vcombine.low %v223_v24, %v227_v25  ;;  %v3395_v37 = vcombine.high %v343_v32, %v347_v33  ;;  %v203_v47 = vld [vmem:[#allocation2 + $0x378] sm:$0xff] }
  0xe0   :  { %2015 = vmatpush1.bf16.msra.mxu0 %v3202_v40  ;;  %2046 = vmatprep.mubr.bf16.mxu0 %v3760_v58  ;;  %v3306_v58 = vcombine.low %v255_v54, %v259_v55  ;;  %v335_v40 = vld [vmem:[#allocation2 + $0x798] sm:$0xff]  ;;  %v3251_v52 = vcombine.high %v199_v46, %v203_v47 }
  0xe1   :  { %2004 = vmatmul.mubr.bf16.vlgmr.msra.gmra.mxu1 %v3786_v23  ;;  %2016 = vmatprep.subr.bf16.mxu0 %v3195_v42  ;;  %v3266_v42 = vcombine.low %v215_v30, %v219_v31  ;;  %v191_v54 = vld [vmem:[#allocation2 + $0x318] sm:$0xff] }
  0xe2   :  { %2058 = vmatpush1.bf16.msra.mxu1 %v3330_v41  ;;  %2089 = vmatprep.mubr.bf16.mxu1 %v3768_v63  ;;  %v3299_v63 = vcombine.high %v247_v0, %v251_v1  ;;  %v339_v41 = vld [vmem:[#allocation2 + $0x7b8] sm:$0xff] }
  0xe3   :  { %2059 = vmatprep.subr.bf16.mxu1 %v3323_v43  ;;  %v3394_v43 = vcombine.low %v343_v32, %v347_v33  ;;  %v3387_v45 = vcombine.high %v335_v40, %v339_v41  ;;  %v195_v55 = vld [vmem:[#allocation2 + $0x338] sm:$0xff] }
  0xe4   :  { %2017 = vmatpush1.bf16.msra.mxu0 %v3194_v48  ;;  %v327_v48 = vld [vmem:[#allocation2 + $0x758] sm:$0xff]  ;;  %v3243_v61 = vcombine.high %v191_v54, %v195_v55 }
  0xe5   :  { %2018 = vmatprep.subr.bf16.mxu0 %v3187_v50  ;;  %v3258_v50 = vcombine.low %v207_v38, %v211_v39  ;;  %v183_v0 = vld [vmem:[#allocation2 + $0x2d8] sm:$0xff]  ;;  %v409_v39 = vld [vmem:[#allocation2 + $0x9e8] sm:$0xff] }
  0xe6   :  { %2060 = vmatpush1.bf16.msra.mxu1 %v3322_v49  ;;  %v331_v49 = vld [vmem:[#allocation2 + $0x778] sm:$0xff] }
  0xe7   :  { %2061 = vmatprep.subr.bf16.mxu1 %v3315_v51  ;;  %v3386_v51 = vcombine.low %v335_v40, %v339_v41  ;;  %v3379_v53 = vcombine.high %v327_v48, %v331_v49  ;;  %v187_v1 = vld [vmem:[#allocation2 + $0x2f8] sm:$0xff]  ;;  %v396_v40 = vld [vmem:[#allocation2 + $0x980] sm:$0xff] }
  0xe8   :  { %2019 = vmatpush1.bf16.msra.mxu0 %v3186_v56  ;;  %v319_v56 = vld [vmem:[#allocation2 + $0x718] sm:$0xff]  ;;  %v3235_v4 = vcombine.high %v183_v0, %v187_v1  ;;  %v400_v41 = vld [vmem:[#allocation2 + $0x9a0] sm:$0xff] }
  0xe9   :  { %2020 = vmatprep.subr.bf16.mxu0 %v3179_v59  ;;  %v3250_v59 = vcombine.low %v199_v46, %v203_v47  ;;  %v175_v6 = vld [vmem:[#allocation2 + $0x298] sm:$0xff]  ;;  %v401_v46 = vld [vmem:[#allocation2 + $0x9a8] sm:$0xff]  ;;  %v388_v47 = vld [vmem:[#allocation2 + $0x940] sm:$0xff] }
  0xea   :  { %2062 = vmatpush1.bf16.msra.mxu1 %v3314_v57  ;;  %v323_v57 = vld [vmem:[#allocation2 + $0x738] sm:$0xff] }
  0xeb   :  { %2063 = vmatprep.subr.bf16.mxu1 %v3307_v60  ;;  %v3378_v60 = vcombine.low %v327_v48, %v331_v49  ;;  %v3371_v62 = vcombine.high %v319_v56, %v323_v57  ;;  %v179_v7 = vld [vmem:[#allocation2 + $0x2b8] sm:$0xff]  ;;  %v392_v49 = vld [vmem:[#allocation2 + $0x960] sm:$0xff] }
  0xec   :  { %2021 = vmatpush1.bf16.msra.mxu0 %v3178_v2  ;;  %v311_v2 = vld [vmem:[#allocation2 + $0x6d8] sm:$0xff]  ;;  %v3227_v12 = vcombine.high %v175_v6, %v179_v7 }
  0xed   :  { %2022 = vmatprep.subr.bf16.mxu0 %v3171_v3  ;;  %v3242_v3 = vcombine.low %v191_v54, %v195_v55  ;;  %v167_v14 = vld [vmem:[#allocation2 + $0x258] sm:$0xff]  ;;  %v380_v54 = vld [vmem:[#allocation2 + $0x900] sm:$0xff] }
  0xee   :  { %2064 = vmatpush1.bf16.msra.mxu1 %v3306_v58  ;;  %v315_v58 = vld [vmem:[#allocation2 + $0x6f8] sm:$0xff]  ;;  %v384_v55 = vld [vmem:[#allocation2 + $0x920] sm:$0xff] }
  0xef   :  { %2065 = vmatprep.subr.bf16.mxu1 %v3299_v63  ;;  %v3370_v63 = vcombine.low %v319_v56, %v323_v57  ;;  %v3363_v5 = vcombine.high %v311_v2, %v315_v58  ;;  %v171_v15 = vld [vmem:[#allocation2 + $0x278] sm:$0xff]  ;;  %v381_v56 = vld [vmem:[#allocation2 + $0x908] sm:$0xff] }
  0xf0   :  { %2023 = vmatpush1.bf16.msra.mxu0 %v3170_v8  ;;  %v303_v8 = vld [vmem:[#allocation2 + $0x698] sm:$0xff]  ;;  %v3219_v21 = vcombine.high %v167_v14, %v171_v15  ;;  %v385_v57 = vld [vmem:[#allocation2 + $0x928] sm:$0xff] }
  0xf1   :  { %2024 = vmatprep.subr.bf16.mxu0 %v3163_v10  ;;  %v3234_v10 = vcombine.low %v183_v0, %v187_v1  ;;  %v159_v24 = vld [vmem:[#allocation2 + $0x218] sm:$0xff]  ;;  %v372_v0 = vld [vmem:[#allocation2 + $0x8c0] sm:$0xff] }
  0xf2   :  { %2066 = vmatpush1.bf16.msra.mxu1 %v3298_v9  ;;  %v307_v9 = vld [vmem:[#allocation2 + $0x6b8] sm:$0xff]  ;;  %v376_v1 = vld [vmem:[#allocation2 + $0x8e0] sm:$0xff] }
  0xf3   :  { %2067 = vmatprep.subr.bf16.mxu1 %v3291_v11  ;;  %v3362_v11 = vcombine.low %v311_v2, %v315_v58  ;;  %v3355_v13 = vcombine.high %v303_v8, %v307_v9  ;;  %v163_v25 = vld [vmem:[#allocation2 + $0x238] sm:$0xff]  ;;  %v373_v2 = vld [vmem:[#allocation2 + $0x8c8] sm:$0xff] }
  0xf4   :  { %2025 = vmatpush1.bf16.msra.mxu0 %v3162_v16  ;;  %v295_v16 = vld [vmem:[#allocation2 + $0x658] sm:$0xff]  ;;  %v3211_v30 = vcombine.high %v159_v24, %v163_v25  ;;  %v3210_v32 = vcombine.low %v159_v24, %v163_v25  ;;  %v377_v58 = vld [vmem:[#allocation2 + $0x8e8] sm:$0xff] }
  0xf5   :  { %2026 = vmatprep.subr.bf16.mxu0 %v3155_v18  ;;  %v3226_v18 = vcombine.low %v175_v6, %v179_v7  ;;  %v3432_v6 = vcombine.low %v372_v0, %v376_v1  ;;  %v3434_v7 = vcombine.low %v373_v2, %v377_v58 }
  0xf6   :  { %2068 = vmatpush1.bf16.msra.mxu1 %v3290_v17  ;;  %v299_v17 = vld [vmem:[#allocation2 + $0x678] sm:$0xff] }
  0xf7   :  { %2069 = vmatprep.subr.bf16.mxu1 %v3283_v19  ;;  %v3354_v19 = vcombine.low %v303_v8, %v307_v9  ;;  %v3347_v22 = vcombine.high %v295_v16, %v299_v17  ;;  %v364_v8 = vld [vmem:[#allocation2 + $0x880] sm:$0xff] }
  0xf8   :  { %2027 = vmatpush1.bf16.msra.mxu0 %v3154_v26  ;;  %v287_v26 = vld [vmem:[#allocation2 + $0x618] sm:$0xff]  ;;  %v368_v9 = vld [vmem:[#allocation2 + $0x8a0] sm:$0xff] }
  0xf9   :  { %2028 = vmatprep.subr.bf16.mxu0 %v3147_v28  ;;  %v3218_v28 = vcombine.low %v167_v14, %v171_v15 }
  0xfa   :  { %2070 = vmatpush1.bf16.msra.mxu1 %v3282_v27  ;;  %v291_v27 = vld [vmem:[#allocation2 + $0x638] sm:$0xff] }
  0xfb   :  { %2071 = vmatprep.subr.bf16.mxu1 %v3275_v29  ;;  %v3346_v29 = vcombine.low %v295_v16, %v299_v17  ;;  %v3339_v31 = vcombine.high %v287_v26, %v291_v27  ;;  %v3338_v33 = vcombine.low %v287_v26, %v291_v27  ;;  %v356_v16 = vld [vmem:[#allocation2 + $0x840] sm:$0xff] }
  0xfc   :  { %2029 = vmatpush1.bf16.msra.mxu0 %v3146_v34  ;;  %v404_v34 = vld [vmem:[#allocation2 + $0x9c0] sm:$0xff] }
  0xfd   :  { %2030 = vmatprep.subr.bf16.mxu0 %v3267_v36  ;;  %v405_v36 = vld [vmem:[#allocation2 + $0x9c8] sm:$0xff]  ;;  %v360_v17 = vld [vmem:[#allocation2 + $0x860] sm:$0xff] }
  0xfe   :  { %2072 = vmatpush1.bf16.msra.mxu1 %v3274_v35  ;;  %v408_v35 = vld [vmem:[#allocation2 + $0x9e0] sm:$0xff] }
  0xff   :  { %2073 = vmatprep.subr.bf16.mxu1 %v3395_v37  ;;  %v3464_v37 = vcombine.low %v404_v34, %v408_v35  ;;  %v3465_v38 = vcombine.high %v404_v34, %v408_v35  ;;  %v348_v26 = vld [vmem:[#allocation2 + $0x800] sm:$0xff] }
 0x100   :  { %2031 = vmatpush2.bf16.msra.mxu0 %v3266_v42  ;;  %v3466_v42 = vcombine.low %v405_v36, %v409_v39  ;;  %v352_v27 = vld [vmem:[#allocation2 + $0x820] sm:$0xff] }
 0x101   :  { %2032 = vmatprep.subr.bf16.mxu0 %v3259_v44  ;;  %v3457_v44 = vcombine.high %v396_v40, %v400_v41  ;;  %v468_v34 = vld [vmem:[#allocation2 + $0xbc0] sm:$0xff] }
 0x102   :  { %2074 = vmatpush2.bf16.msra.mxu1 %v3394_v43  ;;  %v3467_v43 = vcombine.high %v405_v36, %v409_v39  ;;  %v472_v35 = vld [vmem:[#allocation2 + $0xbe0] sm:$0xff]  ;;  %v469_v36 = vld [vmem:[#allocation2 + $0xbc8] sm:$0xff] }
 0x103   :  { %2075 = vmatprep.subr.bf16.mxu1 %v3387_v45  ;;  %v397_v45 = vld [vmem:[#allocation2 + $0x988] sm:$0xff]  ;;  %v3528_v39 = vcombine.low %v468_v34, %v472_v35 }
 0x104   :  { %2033 = vmatpush2.bf16.msra.mxu0 %v3258_v50  ;;  %v3459_v48 = vcombine.high %v397_v45, %v401_v46  ;;  %v393_v50 = vld [vmem:[#allocation2 + $0x968] sm:$0xff] }
 0x105   :  { %2034 = vmatprep.subr.bf16.mxu0 %v3251_v52  ;;  %v3449_v52 = vcombine.high %v388_v47, %v392_v49 }
 0x106   :  { %2076 = vmatpush2.bf16.msra.mxu1 %v3386_v51  ;;  %v3458_v51 = vcombine.low %v397_v45, %v401_v46  ;;  %v465_v46 = vld [vmem:[#allocation2 + $0xba8] sm:$0xff] }
 0x107   :  { %2077 = vmatprep.subr.bf16.mxu1 %v3379_v53 }
 0x108   :  { %2035 = vmatpush2.bf16.msra.mxu0 %v3250_v59  ;;  %v3448_v59 = vcombine.low %v388_v47, %v392_v49 }
 0x109   :  { %2036 = vmatprep.subr.bf16.mxu0 %v3243_v61  ;;  %v3441_v61 = vcombine.high %v380_v54, %v384_v55 }
 0x10a   :  { %2078 = vmatpush2.bf16.msra.mxu1 %v3378_v60 }
 0x10b   :  { %2079 = vmatprep.subr.bf16.mxu1 %v3371_v62  ;;  %v3443_v62 = vcombine.high %v381_v56, %v385_v57 }
 0x10c   :  { %2037 = vmatpush2.bf16.msra.mxu0 %v3242_v3  ;;  %v3440_v3 = vcombine.low %v380_v54, %v384_v55 }
 0x10d   :  { %2038 = vmatprep.subr.bf16.mxu0 %v3235_v4  ;;  %v3433_v4 = vcombine.high %v372_v0, %v376_v1 }
 0x10e   :  { %2080 = vmatpush2.bf16.msra.mxu1 %v3370_v63  ;;  %v3442_v63 = vcombine.low %v381_v56, %v385_v57  ;;  %v444_v56 = vld [vmem:[#allocation2 + $0xb00] sm:$0xff] }
 0x10f   :  { %2081 = vmatprep.subr.bf16.mxu1 %v3363_v5  ;;  %v3435_v5 = vcombine.high %v373_v2, %v377_v58  ;;  %v448_v57 = vld [vmem:[#allocation2 + $0xb20] sm:$0xff] }
 0x110   :  { %2039 = vmatpush2.bf16.msra.mxu0 %v3234_v10  ;;  %v365_v10 = vld [vmem:[#allocation2 + $0x888] sm:$0xff]  ;;  %v436_v2 = vld [vmem:[#allocation2 + $0xac0] sm:$0xff] }
 0x111   :  { %2040 = vmatprep.subr.bf16.mxu0 %v3227_v12  ;;  %v369_v12 = vld [vmem:[#allocation2 + $0x8a8] sm:$0xff]  ;;  %v440_v58 = vld [vmem:[#allocation2 + $0xae0] sm:$0xff] }
 0x112   :  { %2082 = vmatpush2.bf16.msra.mxu1 %v3362_v11  ;;  %v3425_v11 = vcombine.high %v364_v8, %v368_v9  ;;  %v3426_v14 = vcombine.low %v365_v10, %v369_v12  ;;  %v3427_v15 = vcombine.high %v365_v10, %v369_v12  ;;  %v433_v12 = vld [vmem:[#allocation2 + $0xaa8] sm:$0xff] }
 0x113   :  { %2083 = vmatprep.subr.bf16.mxu1 %v3355_v13  ;;  %v3424_v13 = vcombine.low %v364_v8, %v368_v9 }
 0x114   :  { %2041 = vmatpush2.bf16.msra.mxu0 %v3226_v18  ;;  %v3417_v18 = vcombine.high %v356_v16, %v360_v17 }
 0x115   :  { %2042 = vmatprep.subr.bf16.mxu0 %v3219_v21  ;;  %v361_v21 = vld [vmem:[#allocation2 + $0x868] sm:$0xff] }
 0x116   :  { %2084 = vmatpush2.bf16.msra.mxu1 %v3354_v19  ;;  %v357_v19 = vld [vmem:[#allocation2 + $0x848] sm:$0xff] }
 0x117   :  { %2085 = vmatprep.subr.bf16.mxu1 %v3347_v22  ;;  %v3416_v22 = vcombine.low %v356_v16, %v360_v17  ;;  %v3418_v24 = vcombine.low %v357_v19, %v361_v21  ;;  %v3419_v25 = vcombine.high %v357_v19, %v361_v21  ;;  %v421_v16 = vld [vmem:[#allocation2 + $0xa48] sm:$0xff] }
 0x118   :  { %2043 = vmatpush2.bf16.msra.mxu0 %v3218_v28  ;;  %v349_v28 = vld [vmem:[#allocation2 + $0x808] sm:$0xff] }
 0x119   :  { %2044 = vmatprep.subr.bf16.mxu0 %v3211_v30  ;;  %v353_v30 = vld [vmem:[#allocation2 + $0x828] sm:$0xff] }
 0x11a   :  { %2086 = vmatpush2.bf16.msra.mxu1 %v3346_v29  ;;  %v3409_v29 = vcombine.high %v348_v26, %v352_v27  ;;  %v425_v17 = vld [vmem:[#allocation2 + $0xa68] sm:$0xff] }
 0x11b   :  { %2087 = vmatprep.subr.bf16.mxu1 %v3339_v31  ;;  %v3408_v31 = vcombine.low %v348_v26, %v352_v27  ;;  %v413_v26 = vld [vmem:[#allocation2 + $0xa08] sm:$0xff] }
 0x11c   :  { %2045 = vmatpush2.bf16.msra.mxu0 %v3210_v32  ;;  %v3410_v32 = vcombine.low %v349_v28, %v353_v30  ;;  %v417_v27 = vld [vmem:[#allocation2 + $0xa28] sm:$0xff] }
 0x11d   :  { %2838 = vmatprep.subr.bf16.mxu0 %v3465_v38  ;;  %v473_v38 = vld [vmem:[#allocation2 + $0xbe8] sm:$0xff] }
 0x11e   :  { %2088 = vmatpush2.bf16.msra.mxu1 %v3338_v33  ;;  %v3411_v33 = vcombine.high %v349_v28, %v353_v30 }
 0x11f   :  { %2047 = vmatmul.mubr.bf16.vlgmr.msra.gmra.mxu0 %v3784_v20  ;;  %v389_v20 = vld [vmem:[#allocation2 + $0x948] sm:$0xff]  ;;  %2881 = vmatprep.subr.bf16.mxu1 %v3467_v43  ;;  %v464_v43 = vld [vmem:[#allocation2 + $0xba0] sm:$0xff] }
 0x120   :  { %2839 = vmatpush1.bf16.msra.mxu0 %v3464_v37  ;;  %v3451_v53 = vcombine.high %v389_v20, %v393_v50  ;;  %v3450_v60 = vcombine.low %v389_v20, %v393_v50  ;;  %v3529_v37 = vcombine.high %v468_v34, %v472_v35  ;;  %v452_v20 = vld [vmem:[#allocation2 + $0xb40] sm:$0xff]  ;;  %v3802_v34 = vld [vmem:[#allocation2 + $0x9d0] sm:$0xff] }
 0x121   :  { %2090 = vmatmul.mubr.bf16.vlgmr.msra.gmra.mxu1 %v3786_v23  ;;  %v3456_v23 = vcombine.low %v396_v40, %v400_v41  ;;  %2840 = vmatprep.subr.bf16.mxu0 %v3457_v44  ;;  %v3530_v40 = vcombine.low %v469_v36, %v473_v38  ;;  %v3531_v41 = vcombine.high %v469_v36, %v473_v38  ;;  %v461_v44 = vld [vmem:[#allocation2 + $0xb88] sm:$0xff]  ;;  %v456_v50 = vld [vmem:[#allocation2 + $0xb60] sm:$0xff]  ;;  %v3804_v35 = vld [vmem:[#allocation2 + $0x9f0] sm:$0xff] }
 0x122   :  { %2882 = vmatpush1.bf16.msra.mxu1 %v3466_v42  ;;  %v460_v42 = vld [vmem:[#allocation2 + $0xb80] sm:$0xff]  ;;  %v3523_v49 = vcombine.high %v461_v44, %v465_v46  ;;  %v3806_v36 = vld [vmem:[#allocation2 + $0x9d8] sm:$0xff] }
 0x123   :  { %2883 = vmatprep.subr.bf16.mxu1 %v3459_v48  ;;  %v3521_v45 = vcombine.high %v460_v42, %v464_v43  ;;  %v3520_v47 = vcombine.low %v460_v42, %v464_v43  ;;  %v3522_v48 = vcombine.low %v461_v44, %v465_v46  ;;  %v3810_v38 = vld [vmem:[#allocation2 + $0x9f8] sm:$0xff]  ;;  %v1790_v42 = vpop.f32.mrf.mxu0  ;;  %v1833_v44 = vpop.f32.mrf.mxu1 }
 0x124   :  { %2841 = vmatpush1.bf16.msra.mxu0 %v3456_v23  ;;  %v453_v23 = vld [vmem:[#allocation2 + $0xb48] sm:$0xff] }
 0x125   :  { %2842 = vmatprep.subr.bf16.mxu0 %v3449_v52  ;;  %v457_v52 = vld [vmem:[#allocation2 + $0xb68] sm:$0xff]  ;;  %v1792_v43 = vpop.f32.mrf.mxu0  ;;  %v1835_v46 = vpop.f32.mrf.mxu1 }
 0x126   :  { %2884 = vmatpush1.bf16.msra.mxu1 %v3458_v51  ;;  %v3513_v51 = vcombine.high %v452_v20, %v456_v50  ;;  %v3514_v54 = vcombine.low %v453_v23, %v457_v52  ;;  %v3515_v55 = vcombine.high %v453_v23, %v457_v52  ;;  %v61_v52 = vld [vmem:[%s3956_s0 + $0xe8] sm:$0xff] }
 0x127   :  { %2885 = vmatprep.subr.bf16.mxu1 %v3451_v53  ;;  %v3512_v53 = vcombine.low %v452_v20, %v456_v50  ;;  %v53_v20 = vld [vmem:[%s3956_s0 + $0x28] sm:$0xff] }
 0x128   :  { %2843 = vmatpush1.bf16.msra.mxu0 %v3448_v59  ;;  %v445_v59 = vld [vmem:[#allocation2 + $0xb08] sm:$0xff] }
 0x129   :  { %2844 = vmatprep.subr.bf16.mxu0 %v3441_v61  ;;  %v449_v61 = vld [vmem:[#allocation2 + $0xb28] sm:$0xff] }
 0x12a   :  { %2886 = vmatpush1.bf16.msra.mxu1 %v3450_v60  ;;  %v3505_v60 = vcombine.high %v444_v56, %v448_v57  ;;  %v3506_v0 = vcombine.low %v445_v59, %v449_v61  ;;  %v3507_v1 = vcombine.high %v445_v59, %v449_v61 }
 0x12b   :  { %2887 = vmatprep.subr.bf16.mxu1 %v3443_v62  ;;  %v3504_v62 = vcombine.low %v444_v56, %v448_v57 }
 0x12c   :  { %2845 = vmatpush1.bf16.msra.mxu0 %v3440_v3  ;;  %v437_v3 = vld [vmem:[#allocation2 + $0xac8] sm:$0xff] }
 0x12d   :  { %2846 = vmatprep.subr.bf16.mxu0 %v3433_v4  ;;  %v3497_v4 = vcombine.high %v436_v2, %v440_v58 }
 0x12e   :  { %2888 = vmatpush1.bf16.msra.mxu1 %v3442_v63  ;;  %v3496_v63 = vcombine.low %v436_v2, %v440_v58  ;;  %v63_v2 = vld [vmem:[%s3956_s0 + $0xf8] sm:$0xff] }
 0x12f   :  { %2889 = vmatprep.subr.bf16.mxu1 %v3435_v5  ;;  %v441_v5 = vld [vmem:[#allocation2 + $0xae8] sm:$0xff] }
 0x130   :  { %2847 = vmatpush1.bf16.msra.mxu0 %v3432_v6  ;;  %v428_v6 = vld [vmem:[#allocation2 + $0xa80] sm:$0xff]  ;;  %v3498_v8 = vcombine.low %v437_v3, %v441_v5  ;;  %v3499_v9 = vcombine.high %v437_v3, %v441_v5 }
 0x131   :  { %2848 = vmatprep.subr.bf16.mxu0 %v3425_v11  ;;  %v429_v11 = vld [vmem:[#allocation2 + $0xa88] sm:$0xff] }
 0x132   :  { %2890 = vmatpush1.bf16.msra.mxu1 %v3434_v7  ;;  %v432_v7 = vld [vmem:[#allocation2 + $0xaa0] sm:$0xff]  ;;  %v3490_v19 = vcombine.low %v429_v11, %v433_v12 }
 0x133   :  { %2891 = vmatprep.subr.bf16.mxu1 %v3427_v15  ;;  %v3489_v10 = vcombine.high %v428_v6, %v432_v7  ;;  %v424_v15 = vld [vmem:[#allocation2 + $0xa60] sm:$0xff] }
 0x134   :  { %2849 = vmatpush1.bf16.msra.mxu0 %v3424_v13  ;;  %v3491_v13 = vcombine.high %v429_v11, %v433_v12 }
 0x135   :  { %2850 = vmatprep.subr.bf16.mxu0 %v3417_v18  ;;  %v3488_v18 = vcombine.low %v428_v6, %v432_v7 }
 0x136   :  { %2892 = vmatpush1.bf16.msra.mxu1 %v3426_v14  ;;  %v420_v14 = vld [vmem:[#allocation2 + $0xa40] sm:$0xff] }
 0x137   :  { %2893 = vmatprep.subr.bf16.mxu1 %v3419_v25  ;;  %v3481_v21 = vcombine.high %v420_v14, %v424_v15  ;;  %v416_v25 = vld [vmem:[#allocation2 + $0xa20] sm:$0xff]  ;;  %v3480_v28 = vcombine.low %v420_v14, %v424_v15 }
 0x138   :  { %2851 = vmatpush1.bf16.msra.mxu0 %v3416_v22  ;;  %v3483_v22 = vcombine.high %v421_v16, %v425_v17 }
 0x139   :  { %2852 = vmatprep.subr.bf16.mxu0 %v3409_v29  ;;  %v3482_v29 = vcombine.low %v421_v16, %v425_v17 }
 0x13a   :  { %2894 = vmatpush1.bf16.msra.mxu1 %v3418_v24  ;;  %v412_v24 = vld [vmem:[#allocation2 + $0xa00] sm:$0xff] }
 0x13b   :  { %2895 = vmatprep.subr.bf16.mxu1 %v3411_v33  ;;  %v3473_v30 = vcombine.high %v412_v24, %v416_v25  ;;  %v3474_v33 = vcombine.low %v413_v26, %v417_v27 }
 0x13c   :  { %2853 = vmatpush1.bf16.msra.mxu0 %v3408_v31  ;;  %v3475_v31 = vcombine.high %v413_v26, %v417_v27 }
 0x13d   :  { %2854 = vmatprep.subr.bf16.mxu0 %v3529_v37  ;;  %v3469_v37 = vcombine.high %v3802_v34, %v3804_v35 }
 0x13e   :  { %2896 = vmatpush1.bf16.msra.mxu1 %v3410_v32  ;;  %v3472_v32 = vcombine.low %v412_v24, %v416_v25 }
 0x13f   :  { %2897 = vmatprep.subr.bf16.mxu1 %v3531_v41  ;;  %v3471_v41 = vcombine.high %v3806_v36, %v3810_v38 }
 0x140   :  { %2855 = vmatpush2.bf16.msra.mxu0 %v3528_v39  ;;  %v3468_v39 = vcombine.low %v3802_v34, %v3804_v35 }
 0x141   :  { %2856 = vmatprep.subr.bf16.mxu0 %v3521_v45  ;;  %v1794_v45 = vpop.f32.mrf.mxu0 }
 0x142   :  { %2898 = vmatpush2.bf16.msra.mxu1 %v3530_v40  ;;  %v3470_v40 = vcombine.low %v3806_v36, %v3810_v38 }
 0x143   :  { %2899 = vmatprep.subr.bf16.mxu1 %v3523_v49 }
 0x144   :  { %2857 = vmatpush2.bf16.msra.mxu0 %v3520_v47  ;;  %v1796_v47 = vpop.f32.mrf.mxu0 }
 0x145   :  { %2858 = vmatprep.subr.bf16.mxu0 %v3513_v51  ;;  %v60_v51 = vld [vmem:[%s3956_s0 + $0xe0] sm:$0xff]  ;;  %v1797_v59 = vadd.f32 %v1796_v47, %v61_v52 }
 0x146   :  { %2900 = vmatpush2.bf16.msra.mxu1 %v3522_v48  ;;  %v1837_v48 = vpop.f32.mrf.mxu1  ;;  %v1795_v56 = vadd.f32 %v1794_v45, %v60_v51  ;;  %v56_v52 = vld [vmem:[%s3956_s0 + $0x40] sm:$0xff] }
 0x147   :  { %2901 = vmatprep.subr.bf16.mxu1 %v3515_v55  ;;  %v55_v55 = vld [vmem:[%s3956_s0 + $0x38] sm:$0xff] }
 0x148   :  { %2859 = vmatpush2.bf16.msra.mxu0 %v3512_v53  ;;  %v1839_v50 = vpop.f32.mrf.mxu1 }
 0x149   :  { %2860 = vmatprep.subr.bf16.mxu0 %v3505_v60  ;;  %v1840_v3 = vadd.f32 %v1839_v50, %v1797_v59 }
 0x14a   :  { %2902 = vmatpush2.bf16.msra.mxu1 %v3514_v54  ;;  %v1793_v54 = vadd.f32 %v1792_v43, %v53_v20 }
 0x14b   :  { %2903 = vmatprep.subr.bf16.mxu1 %v3507_v1  ;;  %v1838_v1 = vadd.f32 %v1837_v48, %v1795_v56  ;;  %v3399_v12 = vmul.f32 -1.442695, %v1840_v3 }
 0x14c   :  { %2861 = vmatpush2.bf16.msra.mxu0 %v3504_v62  ;;  %v1836_v62 = vadd.f32 %v1835_v46, %v1793_v54 }
 0x14d   :  { %2862 = vmatprep.subr.bf16.mxu0 %v3497_v4 }
 0x14e   :  { %2904 = vmatpush2.bf16.msra.mxu1 %v3506_v0  ;;  %v62_v0 = vld [vmem:[%s3956_s0 + $0xf0] sm:$0xff]  ;;  %v3397_v7 = vmul.f32 -1.442695, %v1836_v62 }
 0x14f   :  { %2905 = vmatprep.subr.bf16.mxu1 %v3499_v9  ;;  %v3398_v9 = vmul.f32 -1.442695, %v1838_v1  ;;  %v58_v62 = vld [vmem:[%s3956_s0 + $0x50] sm:$0xff] }
 0x150   :  { %2863 = vmatpush2.bf16.msra.mxu0 %v3496_v63  ;;  %v52_v63 = vld [vmem:[%s3956_s0 + $0x20] sm:$0xff]  ;;  %3552 = vpow2.f32 %v3397_v7  ;;  %v66_v7 = vld [vmem:[%s3956_s0 + $0x110] sm:$0xff] }
 0x151   :  { %2864 = vmatprep.subr.bf16.mxu0 %v3489_v10  ;;  %v54_v10 = vld [vmem:[%s3956_s0 + $0x30] sm:$0xff]  ;;  %v1791_v11 = vadd.f32 %v1790_v42, %v52_v63  ;;  %3554 = vpow2.f32 %v3398_v9  ;;  %v65_v42 = vld [vmem:[%s3956_s0 + $0x108] sm:$0xff] }
 0x152   :  { %2906 = vmatpush2.bf16.msra.mxu1 %v3498_v8  ;;  %3556 = vpow2.f32 %v3399_v12 }
 0x153   :  { %2907 = vmatprep.subr.bf16.mxu1 %v3491_v13 }
 0x154   :  { %2865 = vmatpush2.bf16.msra.mxu0 %v3488_v18  ;;  %v1834_v18 = vadd.f32 %v1833_v44, %v1791_v11 }
 0x155   :  { %2866 = vmatprep.subr.bf16.mxu0 %v3481_v21 }
 0x156   :  { %2908 = vmatpush2.bf16.msra.mxu1 %v3490_v19  ;;  %v3396_v25 = vmul.f32 -1.442695, %v1834_v18 }
 0x157   :  { %2909 = vmatprep.subr.bf16.mxu1 %v3483_v22 }
 0x158   :  { %2867 = vmatpush2.bf16.msra.mxu0 %v3480_v28 }
 0x159   :  { %2868 = vmatprep.subr.bf16.mxu0 %v3473_v30 }
 0x15a   :  { %2910 = vmatpush2.bf16.msra.mxu1 %v3482_v29 }
 0x15b   :  { %2911 = vmatprep.subr.bf16.mxu1 %v3475_v31  ;;  %v57_v31 = vld [vmem:[%s3956_s0 + $0x48] sm:$0xff] }
 0x15c   :  { %2869 = vmatpush2.bf16.msra.mxu0 %v3472_v32 }
 0x15d   :  { %2924 = vmatprep.subr.bf16.mxu0 %v3469_v37  ;;  %v3553_v30 = vpop.eup %3552  ;;  %v64_v37 = vld [vmem:[%s3956_s0 + $0x100] sm:$0xff] }
 0x15e   :  { %2912 = vmatpush2.bf16.msra.mxu1 %v3474_v33  ;;  %v3555_v33 = vpop.eup %3554  ;;  %v2113_v45 = vadd.f32 1.0, %v3553_v30 }
 0x15f   :  { %2967 = vmatprep.subr.bf16.mxu1 %v3471_v41  ;;  %v1876_v49 = vpop.f32.mrf.mxu0  ;;  %v3557_v41 = vpop.eup %3556  ;;  %v2114_v47 = vadd.f32 1.0, %v3555_v33 }
 0x160   :  { %v1877_v16 = vadd.f32 %v1876_v49, %v54_v10  ;;  %v2115_v20 = vadd.f32 1.0, %v3557_v41  ;;  %v85_v41 = vld [vmem:[%s3956_s0 + $0xa8] sm:$0xff] }
 0x161   :  { %v1878_v23 = vpop.f32.mrf.mxu0  ;;  %v1919_v53 = vpop.f32.mrf.mxu1 }
 0x162   :  { %v1879_v60 = vadd.f32 %v1878_v23, %v55_v55  ;;  %v1920_v22 = vadd.f32 %v1919_v53, %v1877_v16 }
 0x163   :  { %v1880_v57 = vpop.f32.mrf.mxu0  ;;  %v1921_v61 = vpop.f32.mrf.mxu1 }
 0x164   :  { %v1922_v4 = vadd.f32 %v1921_v61, %v1879_v60  ;;  %v1881_v5 = vadd.f32 %v1880_v57, %v62_v0  ;;  %v3400_v27 = vmul.f32 -1.442695, %v1920_v22 }
 0x165   :  { %v1882_v58 = vpop.f32.mrf.mxu0  ;;  %v1923_v6 = vpop.f32.mrf.mxu1 }
 0x166   :  { %v1883_v8 = vadd.f32 %v1882_v58, %v63_v2  ;;  %v3401_v13 = vmul.f32 -1.442695, %v1922_v4  ;;  %v1924_v14 = vadd.f32 %v1923_v6, %v1881_v5  ;;  %v59_v58 = vld [vmem:[%s3956_s0 + $0x58] sm:$0xff] }
 0x167   :  { %v1925_v15 = vpop.f32.mrf.mxu1 }
 0x168   :  { %v1926_v17 = vadd.f32 %v1925_v15, %v1883_v8  ;;  %3558 = vpow2.f32 %v3401_v13  ;;  %v3402_v19 = vmul.f32 -1.442695, %v1924_v14  ;;  %v67_v13 = vld [vmem:[%s3956_s0 + $0x118] sm:$0xff] }
 0x16a   :  { %v3403_v24 = vmul.f32 -1.442695, %v1926_v17  ;;  %3560 = vpow2.f32 %v3402_v19 }
 0x16c   :  { %3562 = vpow2.f32 %v3403_v24 }
 0x16d   :  { %3564 = vpow2.f32 %v3396_v25 }
 0x16e   :  { %3566 = vpow2.f32 %v3400_v27 }
 0x16f   :  { %3568 = vrcp.f32 %v2113_v45 }
 0x170   :  { %3570 = vrcp.f32 %v2114_v47  ;;  %v87_v47 = vld [vmem:[%s3956_s0 + $0x168] sm:$0xff] }
 0x171   :  { %3572 = vrcp.f32 %v2115_v20 }
 0x175   :  { %v3559_v44 = vpop.eup %3558 }
 0x176   :  { %v2137_v23 = vadd.f32 1.0, %v3559_v44  ;;  %v86_v44 = vld [vmem:[%s3956_s0 + $0x160] sm:$0xff] }
 0x177   :  { %v3561_v51 = vpop.eup %3560 }
 0x178   :  { %3574 = vrcp.f32 %v2137_v23  ;;  %v2138_v60 = vadd.f32 1.0, %v3561_v51 }
 0x179   :  { %v3563_v54 = vpop.eup %3562 }
 0x17a   :  { %v3565_v59 = vpop.eup %3564  ;;  %v2139_v0 = vadd.f32 1.0, %v3563_v54 }
 0x17b   :  { %v3567_v1 = vpop.eup %3566  ;;  %v2112_v3 = vadd.f32 1.0, %v3565_v59 }
 0x17c   :  { %v2136_v8 = vadd.f32 1.0, %v3567_v1  ;;  %v3569_v24 = vpop.eup %3568 }
 0x19f   :  { %v1962_v21 = vpop.f32.mrf.mxu0 }
 0x1a0   :  { %v1963_v61 = vadd.f32 %v1962_v21, %v56_v52 }
 0x1a1   :  { %v1964_v26 = vpop.f32.mrf.mxu0  ;;  %v2005_v28 = vpop.f32.mrf.mxu1 }
 0x1a2   :  { %v1965_v46 = vadd.f32 %v1964_v26, %v57_v31  ;;  %v2006_v5 = vadd.f32 %v2005_v28, %v1963_v61  ;;  %v3571_v26 = vpop.eup %3570 }
 0x1a3   :  { %v1966_v29 = vpop.f32.mrf.mxu0  ;;  %v2007_v32 = vpop.f32.mrf.mxu1 }
 0x1a4   :  { %v1967_v48 = vadd.f32 %v1966_v29, %v64_v37  ;;  %v2008_v53 = vadd.f32 %v2007_v32, %v1965_v46  ;;  %v3573_v29 = vpop.eup %3572 }
 0x1a5   :  { %v1968_v43 = vpop.f32.mrf.mxu0  ;;  %v2009_v49 = vpop.f32.mrf.mxu1 }
 0x1a6   :  { %v1969_v50 = vadd.f32 %v1968_v43, %v65_v42  ;;  %v2010_v55 = vadd.f32 %v2009_v49, %v1967_v48  ;;  %3576 = vtanh.f32 %v2008_v53  ;;  %v3575_v30 = vpop.eup %3574 }
 0x1a7   :  { %v2011_v56 = vpop.f32.mrf.mxu1  ;;  %v2177_v48 = vmul.f32 %v3575_v30, %v85_v41  ;;  %v386_v41 = vld [vmem:[#allocation2 + $0x930] sm:$0xff] }
 0x1a8   :  { %v2012_v57 = vadd.f32 %v2011_v56, %v1969_v50  ;;  %3578 = vtanh.f32 %v2010_v55  ;;  %v84_v56 = vld [vmem:[%s3956_s0 + $0xa0] sm:$0xff] }
 0x1aa   :  { %3580 = vtanh.f32 %v2012_v57 }
 0x1ab   :  { %3582 = vrcp.f32 %v2138_v60 }
 0x1ac   :  { %3584 = vrcp.f32 %v2139_v0 }
 0x1ad   :  { %3586 = vrcp.f32 %v2112_v3 }
 0x1ae   :  { %3588 = vtanh.f32 %v2006_v5 }
 0x1af   :  { %3590 = vrcp.f32 %v2136_v8 }
 0x1b3   :  { %v3577_v32 = vpop.eup %3576 }
 0x1b4   :  { %v2181_v43 = vmul.f32 %v3577_v32, %v3569_v24  ;;  %v390_v24 = vld [vmem:[#allocation2 + $0x950] sm:$0xff] }
 0x1b5   :  { %v3579_v33 = vpop.eup %3578 }
 0x1b6   :  { %v2182_v46 = vmul.f32 %v3579_v33, %v3571_v26  ;;  %v2185_v51 = vadd.f32 %v2181_v43, %v2177_v48  ;;  %v387_v43 = vld [vmem:[#allocation2 + $0x938] sm:$0xff] }
 0x1b7   :  { %v3581_v37 = vpop.eup %3580 }
 0x1b8   :  { %v3583_v42 = vpop.eup %3582  ;;  %v2183_v49 = vmul.f32 %v3581_v37, %v3573_v29  ;;  %v395_v29 = vld [vmem:[#allocation2 + $0x978] sm:$0xff]  ;;  %v382_v37 = vld [vmem:[#allocation2 + $0x910] sm:$0xff] }
 0x1b9   :  { %v3585_v45 = vpop.eup %3584  ;;  %v2178_v50 = vmul.f32 %v3583_v42, %v86_v44  ;;  %v383_v42 = vld [vmem:[#allocation2 + $0x918] sm:$0xff]  ;;  %v3445_v36 = vcombine.high %v382_v37, %v386_v41 }
 0x1ba   :  { %v3587_v20 = vpop.eup %3586  ;;  %v2179_v52 = vmul.f32 %v3585_v45, %v87_v47  ;;  %v3447_v38 = vcombine.high %v383_v42, %v387_v43  ;;  %v375_v44 = vld [vmem:[#allocation2 + $0x8d8] sm:$0xff]  ;;  %v3446_v47 = vcombine.low %v383_v42, %v387_v43  ;;  %v450_v42 = vld [vmem:[#allocation2 + $0xb30] sm:$0xff] }
 0x1bb   :  { %v3589_v23 = vpop.eup %3588  ;;  %v2186_v54 = vadd.f32 %v2182_v46, %v2178_v50  ;;  %v379_v45 = vld [vmem:[#allocation2 + $0x8f8] sm:$0xff]  ;;  %v3444_v46 = vcombine.low %v382_v37, %v386_v41  ;;  %v370_v50 = vld [vmem:[#allocation2 + $0x8b0] sm:$0xff] }
 0x1bc   :  { %v3591_v53 = vpop.eup %3590  ;;  %v2187_v57 = vadd.f32 %v2183_v49, %v2179_v52  ;;  %v2180_v60 = vmul.f32 %v3589_v23, %v3587_v20  ;;  %v3439_v49 = vcombine.high %v375_v44, %v379_v45  ;;  %v366_v20 = vld [vmem:[#allocation2 + $0x890] sm:$0xff]  ;;  %v367_v23 = vld [vmem:[#allocation2 + $0x898] sm:$0xff] }
 0x1bd   :  { %v2176_v0 = vmul.f32 %v3591_v53, %v84_v56  ;;  %v3438_v53 = vcombine.low %v375_v44, %v379_v45  ;;  %v358_v56 = vld [vmem:[#allocation2 + $0x850] sm:$0xff]  ;;  %v447_v43 = vld [vmem:[#allocation2 + $0xb18] sm:$0xff] }
 0x1be   :  { %v446_v41 = vld [vmem:[#allocation2 + $0xb10] sm:$0xff]  ;;  %v439_v45 = vld [vmem:[#allocation2 + $0xad8] sm:$0xff] }
 0x1bf   :  { %v2184_v3 = vadd.f32 %v2180_v60, %v2176_v0  ;;  %v363_v60 = vld [vmem:[#allocation2 + $0x878] sm:$0xff]  ;;  %v442_v44 = vld [vmem:[#allocation2 + $0xaf0] sm:$0xff] }
 0x1df   :  { %v2048_v2 = vpop.f32.mrf.mxu0 }
 0x1e0   :  { %v2049_v63 = vadd.f32 %v2048_v2, %v58_v62 }
 0x1e1   :  { %v2091_v4 = vpop.f32.mrf.mxu1  ;;  %v2050_v6 = vpop.f32.mrf.mxu0 }
 0x1e2   :  { %v2092_v9 = vadd.f32 %v2091_v4, %v2049_v63  ;;  %v2051_v10 = vadd.f32 %v2050_v6, %v59_v58 }
 0x1e3   :  { %v2093_v11 = vpop.f32.mrf.mxu1  ;;  %v2052_v12 = vpop.f32.mrf.mxu0 }
 0x1e4   :  { %v3404_v14 = vmul.f32 -1.442695, %v2092_v9  ;;  %v2094_v15 = vadd.f32 %v2093_v11, %v2051_v10  ;;  %v2053_v16 = vadd.f32 %v2052_v12, %v66_v7 }
 0x1e5   :  { %v2095_v17 = vpop.f32.mrf.mxu1  ;;  %v2054_v18 = vpop.f32.mrf.mxu0 }
 0x1e6   :  { %v3405_v19 = vmul.f32 -1.442695, %v2094_v15  ;;  %v2096_v21 = vadd.f32 %v2095_v17, %v2053_v16  ;;  %v2055_v22 = vadd.f32 %v2054_v18, %v67_v13  ;;  %3592 = vpow2.f32 %v3404_v14  ;;  %v398_v15 = vld [vmem:[#allocation2 + $0x990] sm:$0xff]  ;;  %v399_v18 = vld [vmem:[#allocation2 + $0x998] sm:$0xff] }
 0x1e7   :  { %v2097_v25 = vpop.f32.mrf.mxu1  ;;  %v402_v17 = vld [vmem:[#allocation2 + $0x9b0] sm:$0xff] }
 0x1e8   :  { %3594 = vpow2.f32 %v3405_v19  ;;  %v3406_v27 = vmul.f32 -1.442695, %v2096_v21  ;;  %v2098_v28 = vadd.f32 %v2097_v25, %v2055_v22  ;;  %v403_v19 = vld [vmem:[#allocation2 + $0x9b8] sm:$0xff]  ;;  %v3461_v25 = vcombine.high %v398_v15, %v402_v17 }
 0x1e9   :  { %v3463_v26 = vcombine.high %v399_v18, %v403_v19  ;;  %v3460_v30 = vcombine.low %v398_v15, %v402_v17  ;;  %v466_v17 = vld [vmem:[#allocation2 + $0xbb0] sm:$0xff] }
 0x1ea   :  { %3596 = vpow2.f32 %v3406_v27  ;;  %v3407_v31 = vmul.f32 -1.442695, %v2098_v28  ;;  %v394_v27 = vld [vmem:[#allocation2 + $0x970] sm:$0xff]  ;;  %v391_v28 = vld [vmem:[#allocation2 + $0x958] sm:$0xff] }
 0x1eb   :  { %v3453_v32 = vcombine.high %v390_v24, %v394_v27  ;;  %v3455_v33 = vcombine.high %v391_v28, %v395_v29  ;;  %v3452_v34 = vcombine.low %v390_v24, %v394_v27  ;;  %v3454_v35 = vcombine.low %v391_v28, %v395_v29  ;;  %v454_v27 = vld [vmem:[#allocation2 + $0xb50] sm:$0xff]  ;;  %v455_v29 = vld [vmem:[#allocation2 + $0xb58] sm:$0xff] }
 0x1ec   :  { %3598 = vpow2.f32 %v3407_v31  ;;  %v3462_v31 = vcombine.low %v399_v18, %v403_v19  ;;  %v463_v18 = vld [vmem:[#allocation2 + $0xb98] sm:$0xff]  ;;  %v458_v28 = vld [vmem:[#allocation2 + $0xb70] sm:$0xff] }
 0x1ed   :  { %3600 = vtanh.f32 %v2185_v51  ;;  %v371_v51 = vld [vmem:[#allocation2 + $0x8b8] sm:$0xff] }
 0x1ee   :  { %3602 = vtanh.f32 %v2186_v54  ;;  %v3429_v54 = vcombine.high %v366_v20, %v370_v50  ;;  %v467_v19 = vld [vmem:[#allocation2 + $0xbb8] sm:$0xff] }
 0x1ef   :  { %3604 = vtanh.f32 %v2187_v57  ;;  %v362_v57 = vld [vmem:[#allocation2 + $0x870] sm:$0xff] }
 0x1f0   :  { %v3421_v0 = vcombine.high %v358_v56, %v362_v57 }
 0x1f3   :  { %v3593_v55 = vpop.eup %3592 }
 0x1f4   :  { %v2164_v1 = vadd.f32 1.0, %v3593_v55  ;;  %v3431_v55 = vcombine.high %v367_v23, %v371_v51 }
 0x1f5   :  { %v3595_v59 = vpop.eup %3594 }
 0x1f6   :  { %v2165_v61 = vadd.f32 1.0, %v3595_v59  ;;  %v359_v59 = vld [vmem:[#allocation2 + $0x858] sm:$0xff] }
 0x1f7   :  { %v3597_v62 = vpop.eup %3596 }
 0x1f8   :  { %v2166_v2 = vadd.f32 1.0, %v3597_v62  ;;  %3606 = vrcp.f32 %v2165_v61  ;;  %v3428_v61 = vcombine.low %v366_v20, %v370_v50  ;;  %v3430_v62 = vcombine.low %v367_v23, %v371_v51  ;;  %v430_v50 = vld [vmem:[#allocation2 + $0xa90] sm:$0xff]  ;;  %v431_v51 = vld [vmem:[#allocation2 + $0xa98] sm:$0xff] }
 0x1f9   :  { %v3599_v58 = vpop.eup %3598  ;;  %v434_v23 = vld [vmem:[#allocation2 + $0xab0] sm:$0xff] }
 0x1fa   :  { %3608 = vrcp.f32 %v2166_v2  ;;  %v2167_v63 = vadd.f32 1.0, %v3599_v58  ;;  %v3601_v4 = vpop.eup %3600  ;;  %v350_v2 = vld [vmem:[#allocation2 + $0x810] sm:$0xff] }
 0x1fb   :  { %3610 = vrcp.f32 %v2164_v1  ;;  %v3603_v5 = vpop.eup %3602  ;;  %v3423_v1 = vcombine.high %v359_v59, %v363_v60  ;;  %v354_v58 = vld [vmem:[#allocation2 + $0x830] sm:$0xff] }
 0x1fc   :  { %3612 = vrcp.f32 %v2167_v63  ;;  %v3605_v6 = vpop.eup %3604  ;;  %v355_v63 = vld [vmem:[#allocation2 + $0x838] sm:$0xff] }
 0x1fd   :  { %3614 = vtanh.f32 %v2184_v3  ;;  %v351_v3 = vld [vmem:[#allocation2 + $0x818] sm:$0xff] }
 0x205   :  { %v3607_v7 = vpop.eup %3606 }
 0x206   :  { %v2193_v13 = vmul.f32 %v3607_v7, %v3601_v4  ;;  %v3420_v4 = vcombine.low %v358_v56, %v362_v57  ;;  %v3415_v7 = vcombine.high %v351_v3, %v355_v63  ;;  %v422_v57 = vld [vmem:[#allocation2 + $0xa50] sm:$0xff] }
 0x207   :  { %v3609_v8 = vpop.eup %3608 }
 0x208   :  { %v3611_v9 = vpop.eup %3610  ;;  %v2194_v11 = vmul.f32 %v3609_v8, %v3603_v5  ;;  %v3422_v5 = vcombine.low %v359_v59, %v363_v60  ;;  %v470_v8 = vld [vmem:[#allocation2 + $0xbd0] sm:$0xff]  ;;  %v423_v60 = vld [vmem:[#allocation2 + $0xa58] sm:$0xff] }
 0x209   :  { %v3613_v10 = vpop.eup %3612  ;;  %v426_v59 = vld [vmem:[#allocation2 + $0xa70] sm:$0xff] }
 0x20a   :  { %v3615_v12 = vpop.eup %3614  ;;  %v2195_v14 = vmul.f32 %v3613_v10, %v3605_v6  ;;  %v3413_v6 = vcombine.high %v350_v2, %v354_v58  ;;  %v471_v10 = vld [vmem:[#allocation2 + $0xbd8] sm:$0xff] }
 0x20b   :  { %v2192_v16 = vmul.f32 %v3615_v12, %v3611_v9  ;;  %v474_v9 = vld [vmem:[#allocation2 + $0xbf0] sm:$0xff]  ;;  %v3412_v12 = vcombine.low %v350_v2, %v354_v58 }
 0x20c   :  { %v2197_v21 = vpack.c.bf16 %v2195_v14, %v2193_v13  ;;  %v3414_v13 = vcombine.low %v351_v3, %v355_v63  ;;  %v3533_v14 = vcombine.high %v470_v8, %v474_v9  ;;  %v414_v58 = vld [vmem:[#allocation2 + $0xa10] sm:$0xff]  ;;  %v415_v63 = vld [vmem:[#allocation2 + $0xa18] sm:$0xff] }
 0x20d   :  { %v3878_v22 = vpack.c.bf16 %v2194_v11, %v2192_v16  ;;  %v475_v11 = vld [vmem:[#allocation2 + $0xbf8] sm:$0xff]  ;;  %v462_v16 = vld [vmem:[#allocation2 + $0xb90] sm:$0xff] }
 0x20e   :  { %2870 = vmatprep.mubr.bf16.mxu0 %v2197_v21  ;;  %2913 = vmatprep.mubr.bf16.mxu1 %v2197_v21  ;;  %v3535_v15 = vcombine.high %v471_v10, %v475_v11  ;;  %v3534_v24 = vcombine.low %v471_v10, %v475_v11  ;;  %v418_v3 = vld [vmem:[#allocation2 + $0xa30] sm:$0xff] }
 0x20f   :  { %2871 = vmatmul.mubr.bf16.vlgmr.msra.gmra.mxu0 %v3878_v22  ;;  %2914 = vmatmul.mubr.bf16.vlgmr.msra.gmra.mxu1 %v3878_v22 }
 0x210   :  { %2925 = vmatpush1.bf16.msra.mxu0 %v3468_v39  ;;  %2968 = vmatpush1.bf16.msra.mxu1 %v3470_v40  ;;  %v374_v39 = vld [vmem:[#allocation2 + $0x8d0] sm:$0xff] }
 0x211   :  { %2956 = vmatprep.mubr.bf16.mxu0 %v2197_v21  ;;  %2999 = vmatprep.mubr.bf16.mxu1 %v2197_v21  ;;  %v378_v40 = vld [vmem:[#allocation2 + $0x8f0] sm:$0xff]  ;;  %v3532_v21 = vcombine.low %v470_v8, %v474_v9  ;;  %v3476_v9 = vcombine.low %v414_v58, %v418_v3 }
 0x212   :  { %2926 = vmatprep.subr.bf16.mxu0 %v3461_v25  ;;  %2969 = vmatprep.subr.bf16.mxu1 %v3463_v26  ;;  %v3437_v48 = vcombine.high %v374_v39, %v378_v40  ;;  %v3436_v52 = vcombine.low %v374_v39, %v378_v40  ;;  %v3525_v25 = vcombine.high %v462_v16, %v466_v17  ;;  %v438_v40 = vld [vmem:[#allocation2 + $0xad0] sm:$0xff] }
 0x213   :  { %v3527_v26 = vcombine.high %v463_v18, %v467_v19 }
 0x214   :  { %2927 = vmatpush1.bf16.msra.mxu0 %v3460_v30  ;;  %2970 = vmatpush1.bf16.msra.mxu1 %v3462_v31  ;;  %v459_v30 = vld [vmem:[#allocation2 + $0xb78] sm:$0xff]  ;;  %v3524_v31 = vcombine.low %v462_v16, %v466_v17  ;;  %v70_v16 = vld [vmem:[%s3956_s0 + $0x70] sm:$0xff]  ;;  %v69_v17 = vld [vmem:[%s3956_s0 + $0x68] sm:$0xff] }
 0x215   :  { %2928 = vmatprep.subr.bf16.mxu0 %v3453_v32  ;;  %2971 = vmatprep.subr.bf16.mxu1 %v3455_v33  ;;  %v3526_v32 = vcombine.low %v463_v18, %v467_v19  ;;  %v3517_v33 = vcombine.high %v454_v27, %v458_v28  ;;  %v3519_v37 = vcombine.high %v455_v29, %v459_v30 }
 0x218   :  { %2929 = vmatpush1.bf16.msra.mxu0 %v3452_v34  ;;  %2972 = vmatpush1.bf16.msra.mxu1 %v3454_v35  ;;  %v451_v34 = vld [vmem:[#allocation2 + $0xb38] sm:$0xff]  ;;  %v3516_v35 = vcombine.low %v454_v27, %v458_v28  ;;  %v78_v27 = vld [vmem:[%s3956_s0 + $0x130] sm:$0xff] }
 0x219   :  { %2930 = vmatprep.subr.bf16.mxu0 %v3445_v36  ;;  %2973 = vmatprep.subr.bf16.mxu1 %v3447_v38  ;;  %v3518_v36 = vcombine.low %v455_v29, %v459_v30  ;;  %v3509_v38 = vcombine.high %v446_v41, %v450_v42  ;;  %v3511_v39 = vcombine.high %v447_v43, %v451_v34  ;;  %v77_v29 = vld [vmem:[%s3956_s0 + $0x128] sm:$0xff] }
 0x21c   :  { %2931 = vmatpush1.bf16.msra.mxu0 %v3444_v46  ;;  %2974 = vmatpush1.bf16.msra.mxu1 %v3446_v47  ;;  %v443_v46 = vld [vmem:[#allocation2 + $0xaf8] sm:$0xff]  ;;  %v3508_v47 = vcombine.low %v446_v41, %v450_v42 }
 0x21d   :  { %2932 = vmatprep.subr.bf16.mxu0 %v3437_v48  ;;  %2975 = vmatprep.subr.bf16.mxu1 %v3439_v49  ;;  %v3510_v48 = vcombine.low %v447_v43, %v451_v34  ;;  %v3501_v49 = vcombine.high %v438_v40, %v442_v44  ;;  %v3503_v20 = vcombine.high %v439_v45, %v443_v46  ;;  %v79_v41 = vld [vmem:[%s3956_s0 + $0x138] sm:$0xff] }
 0x220   :  { %2933 = vmatpush1.bf16.msra.mxu0 %v3436_v52  ;;  %2976 = vmatpush1.bf16.msra.mxu1 %v3438_v53  ;;  %v435_v52 = vld [vmem:[#allocation2 + $0xab8] sm:$0xff]  ;;  %v3500_v53 = vcombine.low %v438_v40, %v442_v44 }
 0x221   :  { %2934 = vmatprep.subr.bf16.mxu0 %v3429_v54  ;;  %2977 = vmatprep.subr.bf16.mxu1 %v3431_v55  ;;  %v3502_v54 = vcombine.low %v439_v45, %v443_v46  ;;  %v3493_v55 = vcombine.high %v430_v50, %v434_v23  ;;  %v3495_v56 = vcombine.high %v431_v51, %v435_v52 }
 0x224   :  { %2935 = vmatpush1.bf16.msra.mxu0 %v3428_v61  ;;  %2978 = vmatpush1.bf16.msra.mxu1 %v3430_v62  ;;  %v427_v61 = vld [vmem:[#allocation2 + $0xa78] sm:$0xff]  ;;  %v3492_v62 = vcombine.low %v430_v50, %v434_v23 }
 0x225   :  { %2936 = vmatprep.subr.bf16.mxu0 %v3421_v0  ;;  %2979 = vmatprep.subr.bf16.mxu1 %v3423_v1  ;;  %v3494_v0 = vcombine.low %v431_v51, %v435_v52  ;;  %v3485_v1 = vcombine.high %v422_v57, %v426_v59  ;;  %v3487_v2 = vcombine.high %v423_v60, %v427_v61 }
 0x228   :  { %2937 = vmatpush1.bf16.msra.mxu0 %v3420_v4  ;;  %2980 = vmatpush1.bf16.msra.mxu1 %v3422_v5  ;;  %v419_v4 = vld [vmem:[#allocation2 + $0xa38] sm:$0xff]  ;;  %v3484_v5 = vcombine.low %v422_v57, %v426_v59  ;;  %v72_v59 = vld [vmem:[%s3956_s0 + $0x80] sm:$0xff] }
 0x229   :  { %2938 = vmatprep.subr.bf16.mxu0 %v3413_v6  ;;  %2981 = vmatprep.subr.bf16.mxu1 %v3415_v7  ;;  %v3486_v6 = vcombine.low %v423_v60, %v427_v61  ;;  %v3477_v7 = vcombine.high %v414_v58, %v418_v3  ;;  %v3479_v8 = vcombine.high %v415_v63, %v419_v4  ;;  %v74_v60 = vld [vmem:[%s3956_s0 + $0x90] sm:$0xff] }
 0x22a   :  { %v3478_v10 = vcombine.low %v415_v63, %v419_v4 }
 0x22c   :  { %2939 = vmatpush1.bf16.msra.mxu0 %v3412_v12  ;;  %2982 = vmatpush1.bf16.msra.mxu1 %v3414_v13 }
 0x22d   :  { %2940 = vmatprep.subr.bf16.mxu0 %v3533_v14  ;;  %2983 = vmatprep.subr.bf16.mxu1 %v3535_v15  ;;  %v68_v14 = vld [vmem:[%s3956_s0 + $0x60] sm:$0xff] }
 0x230   :  { %2941 = vmatpush2.bf16.msra.mxu0 %v3532_v21  ;;  %2984 = vmatpush2.bf16.msra.mxu1 %v3534_v24  ;;  %v76_v24 = vld [vmem:[%s3956_s0 + $0x120] sm:$0xff] }
 0x231   :  { %2942 = vmatprep.subr.bf16.mxu0 %v3525_v25  ;;  %2985 = vmatprep.subr.bf16.mxu1 %v3527_v26 }
 0x234   :  { %2943 = vmatpush2.bf16.msra.mxu0 %v3524_v31  ;;  %2986 = vmatpush2.bf16.msra.mxu1 %v3526_v32 }
 0x235   :  { %2944 = vmatprep.subr.bf16.mxu0 %v3517_v33  ;;  %2987 = vmatprep.subr.bf16.mxu1 %v3519_v37 }
 0x238   :  { %2945 = vmatpush2.bf16.msra.mxu0 %v3516_v35  ;;  %2988 = vmatpush2.bf16.msra.mxu1 %v3518_v36 }
 0x239   :  { %2946 = vmatprep.subr.bf16.mxu0 %v3509_v38  ;;  %2989 = vmatprep.subr.bf16.mxu1 %v3511_v39 }
 0x23c   :  { %2947 = vmatpush2.bf16.msra.mxu0 %v3508_v47  ;;  %2990 = vmatpush2.bf16.msra.mxu1 %v3510_v48 }
 0x23d   :  { %2948 = vmatprep.subr.bf16.mxu0 %v3501_v49  ;;  %2991 = vmatprep.subr.bf16.mxu1 %v3503_v20 }
 0x240   :  { %2949 = vmatpush2.bf16.msra.mxu0 %v3500_v53  ;;  %2992 = vmatpush2.bf16.msra.mxu1 %v3502_v54 }
 0x241   :  { %2950 = vmatprep.subr.bf16.mxu0 %v3493_v55  ;;  %2993 = vmatprep.subr.bf16.mxu1 %v3495_v56 }
 0x244   :  { %2951 = vmatpush2.bf16.msra.mxu0 %v3492_v62  ;;  %2994 = vmatpush2.bf16.msra.mxu1 %v3494_v0 }
 0x245   :  { %2952 = vmatprep.subr.bf16.mxu0 %v3485_v1  ;;  %2995 = vmatprep.subr.bf16.mxu1 %v3487_v2  ;;  %v73_v1 = vld [vmem:[%s3956_s0 + $0x88] sm:$0xff]  ;;  %v75_v2 = vld [vmem:[%s3956_s0 + $0x98] sm:$0xff] }
 0x248   :  { %2953 = vmatpush2.bf16.msra.mxu0 %v3484_v5  ;;  %2996 = vmatpush2.bf16.msra.mxu1 %v3486_v6  ;;  %v80_v5 = vld [vmem:[%s3956_s0 + $0x140] sm:$0xff]  ;;  %v82_v6 = vld [vmem:[%s3956_s0 + $0x150] sm:$0xff] }
 0x249   :  { %2954 = vmatprep.subr.bf16.mxu0 %v3477_v7  ;;  %2997 = vmatprep.subr.bf16.mxu1 %v3479_v8 }
 0x24c   :  { %2955 = vmatpush2.bf16.msra.mxu0 %v3476_v9  ;;  %2998 = vmatpush2.bf16.msra.mxu1 %v3478_v10 }
 0x24f   :  { %2957 = vmatmul.mubr.bf16.vlgmr.msra.gmra.mxu0 %v3878_v22  ;;  %3000 = vmatmul.mubr.bf16.vlgmr.msra.gmra.mxu1 %v3878_v22  ;;  %v71_v22 = vld [vmem:[%s3956_s0 + $0x78] sm:$0xff] }
 0x2cf   :  { %v2872_v11 = vpop.f32.mrf.mxu0  ;;  %v2915_v12 = vpop.f32.mrf.mxu1 }
 0x2d0   :  { %v2873_v19 = vadd.f32 %v2872_v11, %v68_v14  ;;  %v2916_v21 = vadd.f32 %v2915_v12, %v70_v16  ;;  %v81_v12 = vld [vmem:[%s3956_s0 + $0x148] sm:$0xff] }
 0x2d1   :  { %v2874_v13 = vpop.f32.mrf.mxu0  ;;  %v2917_v15 = vpop.f32.mrf.mxu1 }
 0x2d2   :  { %v2875_v26 = vadd.f32 %v2874_v13, %v69_v17  ;;  %v2918_v28 = vadd.f32 %v2917_v15, %v71_v22  ;;  %v3536_v31 = vmul.f32 -1.442695, %v2873_v19  ;;  %v3540_v33 = vmul.f32 -1.442695, %v2916_v21  ;;  %v83_v13 = vld [vmem:[%s3956_s0 + $0x158] sm:$0xff] }
 0x2d3   :  { %v2876_v18 = vpop.f32.mrf.mxu0  ;;  %v2919_v25 = vpop.f32.mrf.mxu1 }
 0x2d4   :  { %v2877_v32 = vadd.f32 %v2876_v18, %v76_v24  ;;  %v2920_v37 = vadd.f32 %v2919_v25, %v78_v27  ;;  %v3537_v43 = vmul.f32 -1.442695, %v2875_v26  ;;  %v3541_v35 = vmul.f32 -1.442695, %v2918_v28 }
 0x2d5   :  { %v2878_v30 = vpop.f32.mrf.mxu0  ;;  %v2921_v42 = vpop.f32.mrf.mxu1  ;;  %3616 = vpow2.f32 %v3536_v31  ;;  %v88_v31 = vld [vmem:[%s3956_s0 + $0xb0] sm:$0xff] }
 0x2d6   :  { %v2879_v34 = vadd.f32 %v2878_v30, %v77_v29  ;;  %v3538_v36 = vmul.f32 -1.442695, %v2877_v32  ;;  %v2922_v38 = vadd.f32 %v2921_v42, %v79_v41  ;;  %3618 = vpow2.f32 %v3540_v33 }
 0x2d7   :  { %v3542_v39 = vmul.f32 -1.442695, %v2920_v37  ;;  %3620 = vpow2.f32 %v3537_v43  ;;  %v89_v43 = vld [vmem:[%s3956_s0 + $0xb8] sm:$0xff] }
 0x2d8   :  { %v3539_v40 = vmul.f32 -1.442695, %v2879_v34  ;;  %3622 = vpow2.f32 %v3541_v35  ;;  %v3543_v44 = vmul.f32 -1.442695, %v2922_v38 }
 0x2d9   :  { %3624 = vpow2.f32 %v3538_v36 }
 0x2da   :  { %3626 = vpow2.f32 %v3542_v39  ;;  %v90_v39 = vld [vmem:[%s3956_s0 + $0x170] sm:$0xff] }
 0x2db   :  { %3628 = vpow2.f32 %v3539_v40 }
 0x2dc   :  { %3630 = vpow2.f32 %v3543_v44 }
 0x2e2   :  { %v3617_v45 = vpop.eup %3616 }
 0x2e3   :  { %v3619_v46 = vpop.eup %3618  ;;  %v3022_v49 = vadd.f32 1.0, %v3617_v45 }
 0x2e4   :  { %v3621_v47 = vpop.eup %3620  ;;  %v3046_v50 = vadd.f32 1.0, %v3619_v46 }
 0x2e5   :  { %v3623_v48 = vpop.eup %3622  ;;  %v3023_v51 = vadd.f32 1.0, %v3621_v47  ;;  %3632 = vrcp.f32 %v3022_v49 }
 0x2e6   :  { %v3625_v20 = vpop.eup %3624  ;;  %v3047_v53 = vadd.f32 1.0, %v3623_v48  ;;  %3634 = vrcp.f32 %v3046_v50  ;;  %v91_v48 = vld [vmem:[%s3956_s0 + $0x178] sm:$0xff] }
 0x2e7   :  { %v3627_v23 = vpop.eup %3626  ;;  %v3024_v54 = vadd.f32 1.0, %v3625_v20  ;;  %3636 = vrcp.f32 %v3023_v51 }
 0x2e8   :  { %v3629_v52 = vpop.eup %3628  ;;  %v3048_v56 = vadd.f32 1.0, %v3627_v23  ;;  %3638 = vrcp.f32 %v3047_v53  ;;  %v3109_v53 = vlaneseq }
 0x2e9   :  { %v3631_v55 = vpop.eup %3630  ;;  %v3025_v57 = vadd.f32 1.0, %v3629_v52  ;;  %3640 = vrcp.f32 %v3024_v54 }
 0x2ea   :  { %v3049_v61 = vadd.f32 1.0, %v3631_v55  ;;  %3642 = vrcp.f32 %v3048_v56 }
 0x2eb   :  { %3644 = vrcp.f32 %v3025_v57 }
 0x2f2   :  { %v3633_v24 = vpop.eup %3632 }
 0x2f3   :  { %v3635_v26 = vpop.eup %3634 }
 0x2f4   :  { %v3637_v27 = vpop.eup %3636  ;;  %v3086_v41 = vmul.f32 %v3635_v26, %v88_v31 }
 0x2f5   :  { %v3639_v28 = vpop.eup %3638 }
 0x2f6   :  { %v3641_v29 = vpop.eup %3640  ;;  %v3087_v44 = vmul.f32 %v3639_v28, %v89_v43 }
 0x2f7   :  { %v3643_v30 = vpop.eup %3642 }
 0x2f8   :  { %v3645_v32 = vpop.eup %3644  ;;  %v3088_v50 = vmul.f32 %v3643_v30, %v90_v39 }
 0x30f   :  { %v2958_v62 = vpop.f32.mrf.mxu0  ;;  %v3001_v0 = vpop.f32.mrf.mxu1 }
 0x310   :  { %v2959_v58 = vadd.f32 %v2958_v62, %v72_v59  ;;  %v3002_v3 = vadd.f32 %v3001_v0, %v74_v60 }
 0x311   :  { %v2960_v63 = vpop.f32.mrf.mxu0  ;;  %v3003_v4 = vpop.f32.mrf.mxu1 }
 0x312   :  { %3646 = vtanh.f32 %v2959_v58  ;;  %v3544_v7 = vmul.f32 -1.442695, %v3002_v3  ;;  %v2961_v8 = vadd.f32 %v2960_v63, %v73_v1  ;;  %v3004_v9 = vadd.f32 %v3003_v4, %v75_v2  ;;  %v3106_v1 = vld [vmem:[#allocation4] ss:$8 sm:$0x3] }
 0x313   :  { %3648 = vrcp.f32 %v3049_v61  ;;  %v2962_v10 = vpop.f32.mrf.mxu0  ;;  %v3005_v11 = vpop.f32.mrf.mxu1  ;;  %v3110_v61 = vshrl.u32 %v3109_v53, 7 }
 0x314   :  { %3650 = vpow2.f32 %v3544_v7  ;;  %v3545_v14 = vmul.f32 -1.442695, %v3004_v9  ;;  %v2963_v15 = vadd.f32 %v2962_v10, %v80_v5  ;;  %v3006_v16 = vadd.f32 %v3005_v11, %v82_v6 }
 0x315   :  { %3652 = vtanh.f32 %v2961_v8  ;;  %v2964_v17 = vpop.f32.mrf.mxu0  ;;  %v3007_v18 = vpop.f32.mrf.mxu1  ;;  %v3111_v62 = vsub.s32 0, %v3110_v61  ;;  %v3115_v0 = vsub.s32 1, %v3110_v61 }
 0x316   :  { %3654 = vpow2.f32 %v3545_v14  ;;  %v3546_v19 = vmul.f32 -1.442695, %v3006_v16  ;;  %v2965_v22 = vadd.f32 %v2964_v17, %v81_v12  ;;  %v3008_v21 = vadd.f32 %v3007_v18, %v83_v13 }
 0x317   :  { %3656 = vtanh.f32 %v2963_v15  ;;  %v3112_v4 = vrot.slane %v3106_v1, %v3111_v62  ;;  %v3116_v5 = vrot.slane %v3106_v1, %v3115_v0 }
 0x318   :  { %3658 = vpow2.f32 %v3546_v19  ;;  %v3547_v25 = vmul.f32 -1.442695, %v3008_v21 }
 0x319   :  { %3660 = vtanh.f32 %v2965_v22  ;;  %v3107_v22 = vld [vmem:[#allocation4 + $0x1] ss:$0 sm:$0xff] }
 0x31a   :  { %3662 = vpow2.f32 %v3547_v25 }
 0x31f   :  { %v3647_v33 = vpop.eup %3646 }
 0x320   :  { %v3649_v37 = vpop.eup %3648  ;;  %v3090_v42 = vmul.f32 %v3647_v33, %v3633_v24 }
 0x321   :  { %v3651_v34 = vpop.eup %3650  ;;  %v3089_v56 = vmul.f32 %v3649_v37, %v91_v48 }
 0x322   :  { %v3653_v35 = vpop.eup %3652  ;;  %v3094_v36 = vadd.f32 %v3090_v42, %v3086_v41  ;;  %v3074_v38 = vadd.f32 1.0, %v3651_v34 }
 0x323   :  { %v3655_v40 = vpop.eup %3654  ;;  %v3091_v45 = vmul.f32 %v3653_v35, %v3637_v27 }
 0x324   :  { %v3657_v46 = vpop.eup %3656  ;;  %3664 = vtanh.f32 %v3094_v36  ;;  %v3075_v47 = vadd.f32 1.0, %v3655_v40 }
 0x325   :  { %v3659_v49 = vpop.eup %3658  ;;  %3666 = vrcp.f32 %v3074_v38  ;;  %v3095_v20 = vadd.f32 %v3091_v45, %v3087_v44  ;;  %v3092_v23 = vmul.f32 %v3657_v46, %v3641_v29 }
 0x326   :  { %v3661_v51 = vpop.eup %3660  ;;  %3668 = vrcp.f32 %v3075_v47  ;;  %v3076_v52 = vadd.f32 1.0, %v3659_v49 }
 0x327   :  { %v3663_v54 = vpop.eup %3662  ;;  %3670 = vtanh.f32 %v3095_v20  ;;  %v3096_v55 = vadd.f32 %v3092_v23, %v3088_v50  ;;  %v3093_v57 = vmul.f32 %v3661_v51, %v3645_v32 }
 0x328   :  { %3672 = vrcp.f32 %v3076_v52  ;;  %v3077_v59 = vadd.f32 1.0, %v3663_v54 }
 0x329   :  { %3674 = vtanh.f32 %v3096_v55  ;;  %v3097_v60 = vadd.f32 %v3093_v57, %v3089_v56 }
 0x32a   :  { %3676 = vrcp.f32 %v3077_v59 }
 0x32b   :  { %3678 = vtanh.f32 %v3097_v60 }
 0x331   :  { %v3665_v2 = vpop.eup %3664 }
 0x332   :  { %v3667_v58 = vpop.eup %3666 }
 0x333   :  { %v3669_v3 = vpop.eup %3668  ;;  %v3102_v63 = vmul.f32 %v3667_v58, %v3665_v2 }
 0x334   :  { %v3671_v6 = vpop.eup %3670 }
 0x335   :  { %v3673_v7 = vpop.eup %3672  ;;  %v3103_v8 = vmul.f32 %v3671_v6, %v3669_v3  ;;  %v3119_v11 = vmul.f32 %v3112_v4, %v3102_v63 }
 0x336   :  { %v3675_v9 = vpop.eup %3674 }
 0x337   :  { %v3677_v10 = vpop.eup %3676  ;;  %v3120_v12 = vmul.f32 %v3116_v5, %v3103_v8  ;;  %v3104_v13 = vmul.f32 %v3675_v9, %v3673_v7 }
 0x338   :  { %v3679_v14 = vpop.eup %3678 }
 0x339   :  { %v3123_v15 = vadd.f32 %v3120_v12, %v3119_v11  ;;  %v3105_v16 = vmul.f32 %v3679_v14, %v3677_v10  ;;  %v3121_v17 = vmul.f32 %v3112_v4, %v3104_v13 }
 0x33b   :  { %3124 = vadd.xlane.f32.xlu0 %v3123_v15  ;;  %v3122_v18 = vmul.f32 %v3116_v5, %v3105_v16 }
 0x33d   :  { %v3126_v19 = vadd.f32 %v3122_v18, %v3121_v17 }
 0x33f   :  { %3127 = vadd.xlane.f32.xlu0 %v3126_v19 }
 0x3c4   :  { %v3125_v21 = vpop.xlane.xlu0 %3124 }
 0x3c5   :  { %v3129_v24 = vadd.f32 %v3125_v21, %v3107_v22 }
 0x3c7   :  { %3132 = vst.msk [vmem:[%s3959_s3] sm:$0xff] %vm3131_vm0, %v3129_v24 }
 0x3c8   :  { %v3128_v25 = vpop.xlane.xlu0 %3127 }
 0x3c9   :  { %v3130_v26 = vadd.f32 %v3128_v25, %v3107_v22 }
 0x3cb   :  { %3133 = vst.msk [vmem:[%s3959_s3 + $0x8] sm:$0xff] %vm3131_vm0, %v3130_v26 }
 0x3cc   :  { %3138 = vsyncpa [#allocation3], 1 }
 0x3cd   :  { %3139 = vsyncpa [#allocation5], 1 }

</bundles_post_ra>
